<compile_context>
chip_gen: v7x
topology: tpu7x:2x2x1
jax: 0.10.0
libtpu: 0.0.40
codegen_flags: <defaults>
</compile_context>

<pallas_src>
import functools

import numpy as np
import jax
import jax.numpy as jnp
from jax import lax
from jax.experimental import pallas as pl
from jax.experimental.pallas import tpu as pltpu

# ---- NVP hyper-parameters (match NVPWarp.__init__) --------------------------
N_COUPLING = 2                       # D = 2 coupling layers
FEAT_DIMS = 128                      # TimeEmbedding.out_channels (default)
PROJ_DIMS = 32                       # proj_dims
HIDDEN = [32, 16, 16, 8, 8]          # hidden_size of map_s / map_t MLPs
CODE_PROJ = [32, 32, 32]             # code_proj_hidden_size
NUM_FREQ_T = 6
XYZ_DIMS = 3
MLP_DIMS = ([(FEAT_DIMS + PROJ_DIMS, HIDDEN[0])]
            + list(zip(HIDDEN[:-1], HIDDEN[1:]))
            + [(HIDDEN[-1], XYZ_DIMS)])
# -> [(160,32), (32,16), (16,16), (16,8), (8,8), (8,3)] : 6 linears per MLP
FUSED_OUT = [2 * o for _, o in MLP_DIMS]                     # [64,32,32,16,16,6]
FUSED_IN = [PROJ_DIMS] + [2 * i for i, _ in MLP_DIMS[1:]]    # [32,64,32,32,16,16]
N_FUSED_MM = len(MLP_DIMS) - 1                               # 5 MXU matmuls/layer


def _leaky(x):
    return jnp.where(x > 0, x, 0.01 * x)   # nn.LeakyReLU default slope


# ----------------------------- Pallas kernel ---------------------------------
def nvp_kernel(cb_ref, xyz_ref, a0_ref,
               w1_ref, b1_ref, w2_ref, b2_ref, w3_ref, b3_ref,
               w4_ref, b4_ref, w5_ref, b5_ref,
               out_ref, h0_ref, *, backward: bool, tm: int, pts: int):
    ws = (w1_ref, w2_ref, w3_ref, w4_ref, w5_ref)   # (L, out, in) bf16 fused s|t
    bs = (b1_ref, b2_ref, b3_ref, b4_ref, b5_ref)   # (L, out, 1)  f32

    y = xyz_ref[...]                                 # (3, tm*pts) f32, lane-dense

    order = range(N_COUPLING - 1, -1, -1) if backward else range(N_COUPLING)
    for l in order:
        c = l % XYZ_DIMS
        a0 = a0_ref[l]                               # (64, 1) f32 = W0_fused @ Wp[c]
        yc = y[c:c + 1, :]                           # (1, tm*pts) conditioning channel

        # Layer 0 of the fused s|t MLP is rank-1 in y_c: pure VPU broadcast-FMA.
        # Per-sample code bias is added on aligned lane slices (pts % 128 == 0).
        for m in range(tm):
            h0_ref[:, m * pts:(m + 1) * pts] = (
                a0 * yc[:, m * pts:(m + 1) * pts] + cb_ref[m, :, l:l + 1])
        h = _leaky(h0_ref[...])                      # (64, tm*pts) f32

        # Remaining 5 fused block-diagonal matmuls: bf16 on the MXU, f32 accum,
        # issued ONCE per coupling layer for all tm samples.
        for k in range(N_FUSED_MM):
            h = jnp.dot(ws[k][l], h.astype(jnp.bfloat16),
                        preferred_element_type=jnp.float32) + bs[k][l]
            if k < N_FUSED_MM - 1:
                h = _leaky(h)

        s = jnp.clip(h[:XYZ_DIMS, :], -10.0, 10.0)   # Hardtanh on s
        t = h[XYZ_DIMS:2 * XYZ_DIMS, :]
        if backward:   # CouplingLayer.inverse
            z = y * jnp.exp(s) + t
        else:          # CouplingLayer.forward
            z = (y - t) * jnp.exp(-s)
        # Keep channel c untouched; masks built in-kernel (no captured constants).
        row = lax.broadcasted_iota(jnp.int32, z.shape, 0)
        y = jnp.where(row == c, y, z)

    out_ref[...] = y.astype(out_ref.dtype)


def nvp_warp_pallas(code_bias, xyz_ff, coupling_params, backward=False,
                    lane_tile=4096):
    """code_bias: (M, 64, L) f32; xyz_ff: (M, 3, P) f32 feature-first, P%128==0."""
    M, _, P = xyz_ff.shape
    assert P % 128 == 0
    L = N_COUPLING

    # Samples fused onto the lane axis: target LANE = tm*P in the 2-8K range,
    # but keep >= 2 grid steps so v7x's two TensorCores both get work.
    tm = max(1, min(lane_tile // P, M))
    if M >= 2:
        tm = min(tm, (M + 1) // 2)
    m_pad = pl.cdiv(M, tm) * tm
    if m_pad != M:
        xyz_ff = jnp.pad(xyz_ff, ((0, m_pad - M), (0, 0), (0, 0)))
        code_bias = jnp.pad(code_bias, ((0, m_pad - M), (0, 0), (0, 0)))
    lane = tm * P
    # (3, M*P): sample m occupies lanes [m*P, (m+1)*P).
    xyz_flat = jnp.transpose(xyz_ff, (1, 0, 2)).reshape(XYZ_DIMS, m_pad * P)

    def wspec(a):  # whole (tiny) weight array resident in VMEM, constant index
        return pl.BlockSpec(a.shape, lambda mi: (0, 0, 0))

    in_specs = [
        pl.BlockSpec((tm, 2 * HIDDEN[0], L), lambda mi: (mi, 0, 0)),   # code bias
        pl.BlockSpec((XYZ_DIMS, lane), lambda mi: (0, mi)),            # points
    ] + [wspec(a) for a in coupling_params]

    macs = sum(o * i for o, i in zip(FUSED_OUT[1:], FUSED_IN[1:]))     # per point/layer
    cost = pl.CostEstimate(
        flops=2 * macs * m_pad * P * L,
        transcendentals=XYZ_DIMS * m_pad * P * L,
        bytes_accessed=(2 * 4 * XYZ_DIMS * m_pad * P
                        + 4 * m_pad * 2 * HIDDEN[0] * L
                        + sum(int(a.size) * a.dtype.itemsize
                              for a in coupling_params)))

    out = pl.pallas_call(
        functools.partial(nvp_kernel, backward=backward, tm=tm, pts=P),
        grid=(m_pad // tm,),
        in_specs=in_specs,
        out_specs=pl.BlockSpec((XYZ_DIMS, lane), lambda mi: (0, mi)),
        out_shape=jax.ShapeDtypeStruct((XYZ_DIMS, m_pad * P), jnp.float32),
        scratch_shapes=[pltpu.VMEM((2 * HIDDEN[0], lane), jnp.float32)],
        # Independent grid steps -> shard across v7x's two TensorCores; keep
        # an explicit VMEM budget so tile choices stay portable to 64 MiB v7x.
        compiler_params=pltpu.CompilerParams(
            dimension_semantics=("parallel",),
            vmem_limit_bytes=32 * 1024 * 1024),
        cost_estimate=cost,
    )(code_bias, xyz_flat, *coupling_params)
    # TODO(synk): for very large P, add a second grid axis over lane tiles
    # within a sample instead of relying on a single (3, P) block.
    return out.reshape(XYZ_DIMS, m_pad, P).transpose(1, 0, 2)[:M]


# --------------------------- parameters (synthetic) ---------------------------
def _linear_init(key, fan_in, fan_out):
    kw, kb = jax.random.split(key)
    bound = 1.0 / np.sqrt(fan_in)
    w = jax.random.uniform(kw, (fan_in, fan_out), jnp.float32, -bound, bound)
    b = jax.random.uniform(kb, (fan_out,), jnp.float32, -bound, bound)
    return w, b


def init_params(key, num_inst):
    keys = iter(jax.random.split(key, 512))

    # TimeEmbedding: PosEmbedding(1, NUM_FREQ_T) -> 13 ch -> Linear(13,128) plus
    # a learned per-video instance code (simplified lab4d TimeEmbedding).
    t_in = 1 + 2 * NUM_FREQ_T
    w_t, b_t = _linear_init(next(keys), t_in, FEAT_DIMS)
    inst_code = 0.1 * jax.random.normal(next(keys), (num_inst, FEAT_DIMS), jnp.float32)

    # Per-coupling-layer code projectors: 128 -> 32 -> 32 -> 32 -> 128.
    code_proj = []
    for _ in range(N_COUPLING):
        dims = [FEAT_DIMS] + CODE_PROJ + [FEAT_DIMS]
        code_proj.append([_linear_init(next(keys), a, b)
                          for a, b in zip(dims[:-1], dims[1:])])

    # Raw per-branch weights kept for the pure-JAX reference.
    raw = {"wp": [], "bp": [], "ws_s": [], "bs_s": [], "ws_t": [], "bs_t": []}

    a0_list, w0bp_list, w0_code, b0_bias = [], [], [], []
    wkf = [[] for _ in range(N_FUSED_MM)]
    bkf = [[] for _ in range(N_FUSED_MM)]
    for l in range(N_COUPLING):
        c = l % XYZ_DIMS
        wp, bp = _linear_init(next(keys), XYZ_DIMS, PROJ_DIMS)   # 'simple' projection
        raw["wp"].append(wp)
        raw["bp"].append(bp)

        lw = [[None, None] for _ in MLP_DIMS]
        lb = [[None, None] for _ in MLP_DIMS]
        for st in range(2):                      # 0 = map_s, 1 = map_t
            for k, (fi, fo) in enumerate(MLP_DIMS):
                wk, bk = _linear_init(next(keys), fi, fo)
                lw[k][st] = wk
                lb[k][st] = bk
        raw["ws_s"].append([lw[k][0] for k in range(len(MLP_DIMS))])
        raw["bs_s"].append([lb[k][0] for k in range(len(MLP_DIMS))])
        raw["ws_t"].append([lw[k][1] for k in range(len(MLP_DIMS))])
        raw["bs_t"].append([lb[k][1] for k in range(len(MLP_DIMS))])

        # Layer 0 split: code part -> glue; proj part folded rank-1 (y only hits
        # channel c through Wp), so the kernel only needs a0 = W0_fused @ Wp[c].
        w0f = jnp.concatenate([lw[0][0][FEAT_DIMS:, :].T,
                               lw[0][1][FEAT_DIMS:, :].T], axis=0)   # (64, 32) f32
        a0_list.append(w0f @ wp[c, :])                               # (64,)
        w0bp_list.append(w0f @ bp)                                   # (64,)
        w0_code.append(jnp.stack([lw[0][0][:FEAT_DIMS, :],
                                  lw[0][1][:FEAT_DIMS, :]]))         # (2,128,32)
        b0_bias.append(jnp.stack([lb[0][0], lb[0][1]]))              # (2,32)

        # Layers 1..5: block-diagonal fused s/t weights (leave fused: structural
        # zeros are free on the MXU and fusion halves weight pushes).
        for k in range(1, len(MLP_DIMS)):
            fi, fo = MLP_DIMS[k]
            wf = jnp.zeros((2 * fo, 2 * fi), jnp.float32)
            wf = wf.at[:fo, :fi].set(lw[k][0].T).at[fo:, fi:].set(lw[k][1].T)
            wkf[k - 1].append(wf)
            bkf[k - 1].append(jnp.concatenate([lb[k][0], lb[k][1]])[:, None])

    coupling = [jnp.stack(a0_list)[:, :, None]]                 # (L, 64, 1) f32
    for k in range(N_FUSED_MM):
        coupling += [jnp.stack(wkf[k]).astype(jnp.bfloat16),    # (L, 2fo, 2fi) bf16
                     jnp.stack(bkf[k])]                         # (L, 2fo, 1)   f32

    return {"w_t": w_t, "b_t": b_t, "inst_code": inst_code,
            "code_proj": code_proj, "coupling": coupling,
            "w0_code": jnp.stack(w0_code),    # (L, 2, 128, 32) f32 (glue only)
            "b0_bias": jnp.stack(b0_bias),    # (L, 2, 32)      f32 (glue only)
            "w0_bp": jnp.stack(w0bp_list),    # (L, 64)         f32 (glue only)
            "raw": raw}


# ------------------------------ JAX glue --------------------------------------
def time_embedding(params, frame_id, frame_offset):
    fo = jnp.asarray(frame_offset, jnp.int32)
    vid = jnp.clip(jnp.searchsorted(fo, frame_id, side="right") - 1, 0, fo.shape[0] - 2)
    start = fo[vid]
    length = jnp.maximum(fo[vid + 1] - start - 1, 1)
    t = (frame_id - start).astype(jnp.float32) / length.astype(jnp.float32)   # (M,)
    freqs = 2.0 ** jnp.arange(NUM_FREQ_T, dtype=jnp.float32)
    ang = t[:, None] * freqs[None, :]
    feat = jnp.concatenate([t[:, None], jnp.sin(ang), jnp.cos(ang)], axis=-1)  # (M,13)
    return feat @ params["w_t"] + params["b_t"] + params["inst_code"][vid]     # (M,C)


def project_codes(params, t_embed):
    outs = []
    for l in range(N_COUPLING):
        h = t_embed
        layers = params["code_proj"][l]
        for i, (w, b) in enumerate(layers):
            h = h @ w + b
            if i < len(layers) - 1:
                h = _leaky(h)
        outs.append(h)
    return jnp.stack(outs, axis=1)        # (M, L, C)


def code_first_layer_bias(params, codes):
    # Point-independent part of the first MLP layer, hoisted out of the kernel:
    # code @ W0_code + b0 + W0_fused @ bp  (per-sample, per-layer constant).
    cb = jnp.einsum('mlc,lsch->mlsh', codes, params["w0_code"]) + params["b0_bias"][None]
    M = codes.shape[0]
    cb = cb.reshape(M, N_COUPLING, 2 * HIDDEN[0]) + params["w0_bp"][None]
    return jnp.transpose(cb, (0, 2, 1))   # (M, 64, L): rows 0..31 -> s, 32..63 -> t


def nvp_warp_forward(params, xyz, frame_id, inst_id, frame_offset,
                     backward=False, lane_tile=4096):
    """NVPWarp.forward: xyz (M,N,D,3), frame_id (M,), inst_id (M,) -> (M,N,D,3)."""
    del inst_id  # NVPWarp conditions on frame_id's video only (via TimeEmbedding)
    M, N, Dpts, _ = xyz.shape
    t_embed = time_embedding(params, frame_id, frame_offset)   # (M, C)
    codes = project_codes(params, t_embed)                     # (M, L, C)
    cb = code_first_layer_bias(params, codes)                  # (M, 64, L)

    P0 = N * Dpts
    p_pad = ((P0 + 127) // 128) * 128
    pts = xyz.reshape(M, P0, XYZ_DIMS).astype(jnp.float32)
    if p_pad != P0:
        pts = jnp.pad(pts, ((0, 0), (0, p_pad - P0), (0, 0)))
    pts_ff = jnp.transpose(pts, (0, 2, 1))                     # (M, 3, p_pad)

    out = nvp_warp_pallas(cb, pts_ff, params["coupling"], backward=backward,
                          lane_tile=lane_tile)                 # (M, 3, p_pad)
    out = out[:, :, :P0]
    return jnp.transpose(out, (0, 2, 1)).reshape(M, N, Dpts, XYZ_DIMS)


# --------------------- pure-JAX reference (un-fused math) ---------------------
def nvp_warp_reference(params, xyz, frame_id, frame_offset, backward=False):
    raw = params["raw"]
    M, N, Dp, _ = xyz.shape
    t_embed = time_embedding(params, frame_id, frame_offset)
    codes = project_codes(params, t_embed)                     # (M, L, C)
    y = xyz.reshape(M, -1, XYZ_DIMS).astype(jnp.float32)
    Pn = y.shape[1]

    def run_mlp(x, ws_, bs_):
        h = x
        for k in range(len(ws_)):
            h = h @ ws_[k] + bs_[k]
            if k < len(ws_) - 1:
                h = _leaky(h)
        return h

    order = range(N_COUPLING - 1, -1, -1) if backward else range(N_COUPLING)
    for l in order:
        c = l % XYZ_DIMS
        mask = (jnp.arange(XYZ_DIMS) == c).astype(jnp.float32)
        y1 = y * mask
        proj = y1 @ raw["wp"][l] + raw["bp"][l]                # (M,P,32)
        code = jnp.broadcast_to(codes[:, l][:, None, :], (M, Pn, FEAT_DIMS))
        inp = jnp.concatenate([code, proj], axis=-1)           # (M,P,160)
        s = jnp.clip(run_mlp(inp, raw["ws_s"][l], raw["bs_s"][l]), -10.0, 10.0)
        t = run_mlp(inp, raw["ws_t"][l], raw["bs_t"][l])
        if backward:
            z = y * jnp.exp(s) + t
        else:
            z = (y - t) * jnp.exp(-s)
        y = y1 + (1.0 - mask) * z
    return y.reshape(M, N, Dp, XYZ_DIMS)


# --------------------------------- demo ---------------------------------------
if __name__ == "__main__":
    M, N, Dpts = 2, 16, 8             # P = N*Dpts = 128 points per sample
    frame_offset = [0, 16]            # one video with 16 frames -> num_inst = 1
    num_inst = len(frame_offset) - 1

    root = jax.random.PRNGKey(0)
    k_param, k_xyz, k_xyz2 = jax.random.split(root, 3)
    params = init_params(k_param, num_inst)

    xyz = jax.random.normal(k_xyz, (M, N, Dpts, XYZ_DIMS), jnp.float32)
    frame_id = jnp.array([3, 11], dtype=jnp.int32)
    inst_id = jnp.array([0, 0], dtype=jnp.int32)

    out = nvp_warp_forward(params, xyz, frame_id, inst_id, frame_offset,
                           backward=False)
    out = jax.block_until_ready(out)
    assert out.shape == xyz.shape and out.dtype == jnp.float32
    assert bool(jnp.all(jnp.isfinite(out)))

    # Check against un-fused pure-JAX reference (bf16 weights -> loose tol).
    ref = nvp_warp_reference(params, xyz, frame_id, frame_offset, backward=False)
    err = float(jnp.max(jnp.abs(out - ref)))
    assert err < 5e-2, f"forward mismatch vs reference: {err}"

    # Inverse path should round-trip.
    back = nvp_warp_forward(params, out, frame_id, inst_id, frame_offset,
                            backward=True)
    rt = float(jnp.max(jnp.abs(back - xyz)))
    assert rt < 1e-2, f"round-trip error: {rt}"

    # Larger batch to exercise the lane-fused multi-sample path (tm > 1).
    M2 = 8
    xyz2 = jax.random.normal(k_xyz2, (M2, N, Dpts, XYZ_DIMS), jnp.float32)
    fid2 = jnp.arange(M2, dtype=jnp.int32)
    iid2 = jnp.zeros((M2,), jnp.int32)
    out2 = nvp_warp_forward(params, xyz2, fid2, iid2, frame_offset,
                            backward=False, lane_tile=512)
    out2 = jax.block_until_ready(out2)
    ref2 = nvp_warp_reference(params, xyz2, fid2, frame_offset, backward=False)
    err2 = float(jnp.max(jnp.abs(out2 - ref2)))
    assert err2 < 5e-2, f"batched forward mismatch vs reference: {err2}"

    print("KERNEL_OK")
</pallas_src>

<mosaic_0001>
module attributes {stable_mosaic.version = 11 : i64} {
  func.func @nvp_kernel(%arg0: i32, %arg1: memref<1x64x2xf32, #tpu.memory_space<vmem>>, %arg2: memref<3x128xf32, #tpu.memory_space<vmem>>, %arg3: memref<2x64x1xf32, #tpu.memory_space<vmem>>, %arg4: memref<2x32x64xbf16, #tpu.memory_space<vmem>>, %arg5: memref<2x32x1xf32, #tpu.memory_space<vmem>>, %arg6: memref<2x32x32xbf16, #tpu.memory_space<vmem>>, %arg7: memref<2x32x1xf32, #tpu.memory_space<vmem>>, %arg8: memref<2x16x32xbf16, #tpu.memory_space<vmem>>, %arg9: memref<2x16x1xf32, #tpu.memory_space<vmem>>, %arg10: memref<2x16x16xbf16, #tpu.memory_space<vmem>>, %arg11: memref<2x16x1xf32, #tpu.memory_space<vmem>>, %arg12: memref<2x6x16xbf16, #tpu.memory_space<vmem>>, %arg13: memref<2x6x1xf32, #tpu.memory_space<vmem>>, %arg14: memref<3x128xf32, #tpu.memory_space<vmem>>, %arg15: memref<64x128xf32, #tpu.memory_space<vmem>>) attributes {dimension_semantics = [#tpu.dimension_semantics<parallel>], iteration_bounds = array<i64: 2>, scalar_prefetch = 0 : i64, scratch_operands = 1 : i64, tpu.core_type = #tpu.core_type<tc>, window_params = [{transform_indices = @transform_0, window_bounds = array<i64: 1, 64, 2>}, {transform_indices = @transform_1, window_bounds = array<i64: 3, 128>}, {pipeline_mode = #tpu.pipeline_mode<synchronous>, transform_indices = @transform_2, window_bounds = array<i64: 2, 64, 1>}, {pipeline_mode = #tpu.pipeline_mode<synchronous>, transform_indices = @transform_3, window_bounds = array<i64: 2, 32, 64>}, {pipeline_mode = #tpu.pipeline_mode<synchronous>, transform_indices = @transform_4, window_bounds = array<i64: 2, 32, 1>}, {pipeline_mode = #tpu.pipeline_mode<synchronous>, transform_indices = @transform_5, window_bounds = array<i64: 2, 32, 32>}, {pipeline_mode = #tpu.pipeline_mode<synchronous>, transform_indices = @transform_6, window_bounds = array<i64: 2, 32, 1>}, {pipeline_mode = #tpu.pipeline_mode<synchronous>, transform_indices = @transform_7, window_bounds = array<i64: 2, 16, 32>}, {pipeline_mode = #tpu.pipeline_mode<synchronous>, transform_indices = @transform_8, window_bounds = array<i64: 2, 16, 1>}, {pipeline_mode = #tpu.pipeline_mode<synchronous>, transform_indices = @transform_9, window_bounds = array<i64: 2, 16, 16>}, {pipeline_mode = #tpu.pipeline_mode<synchronous>, transform_indices = @transform_10, window_bounds = array<i64: 2, 16, 1>}, {pipeline_mode = #tpu.pipeline_mode<synchronous>, transform_indices = @transform_11, window_bounds = array<i64: 2, 6, 16>}, {pipeline_mode = #tpu.pipeline_mode<synchronous>, transform_indices = @transform_12, window_bounds = array<i64: 2, 6, 1>}, {transform_indices = @transform_13, window_bounds = array<i64: 3, 128>}]} {
    %c0 = arith.constant 0 : index
    %c0_0 = arith.constant 0 : index
    %0 = vector.load %arg2[%c0, %c0_0] : memref<3x128xf32, #tpu.memory_space<vmem>>, vector<3x128xf32>
    %c0_1 = arith.constant 0 : index
    %c0_2 = arith.constant 0 : index
    %c0_3 = arith.constant 0 : index
    %1 = vector.load %arg3[%c0_1, %c0_2, %c0_3] : memref<2x64x1xf32, #tpu.memory_space<vmem>>, vector<1x64x1xf32>
    %2 = vector.shape_cast %1 : vector<1x64x1xf32> to vector<64x1xf32>
    %3 = vector.extract_strided_slice %0 {offsets = [0, 0], sizes = [1, 128], strides = [1, 1]} : vector<3x128xf32> to vector<1x128xf32>
    %4 = vector.broadcast %2 : vector<64x1xf32> to vector<64x128xf32>
    %5 = vector.broadcast %3 : vector<1x128xf32> to vector<64x128xf32>
    %6 = arith.mulf %4, %5 : vector<64x128xf32>
    %c0_4 = arith.constant 0 : index
    %c0_5 = arith.constant 0 : index
    %c0_6 = arith.constant 0 : index
    %7 = vector.load %arg1[%c0_4, %c0_5, %c0_6] : memref<1x64x2xf32, #tpu.memory_space<vmem>>, vector<1x64x1xf32>
    %8 = vector.shape_cast %7 : vector<1x64x1xf32> to vector<64x1xf32>
    %9 = vector.broadcast %8 : vector<64x1xf32> to vector<64x128xf32>
    %10 = arith.addf %6, %9 : vector<64x128xf32>
    %c0_7 = arith.constant 0 : index
    %c0_8 = arith.constant 0 : index
    %11 = vector.load %arg15[%c0_7, %c0_8] : memref<64x128xf32, #tpu.memory_space<vmem>>, vector<64x128xf32>
    tpu.vector_store %arg15[%c0_7, %c0_8], %10 {strides = array<i32>} : memref<64x128xf32, #tpu.memory_space<vmem>>, vector<64x128xf32>,
    %c0_9 = arith.constant 0 : index
    %c0_10 = arith.constant 0 : index
    %12 = vector.load %arg15[%c0_9, %c0_10] : memref<64x128xf32, #tpu.memory_space<vmem>>, vector<64x128xf32>
    %cst = arith.constant 0.000000e+00 : f32
    %13 = vector.broadcast %cst : f32 to vector<64x128xf32>
    %14 = arith.cmpf ogt, %12, %13 : vector<64x128xf32>
    %cst_11 = arith.constant 0.00999999977 : f32
    %15 = vector.broadcast %cst_11 : f32 to vector<64x128xf32>
    %16 = arith.mulf %15, %12 : vector<64x128xf32>
    %17 = arith.select %14, %12, %16 : vector<64x128xi1>, vector<64x128xf32>
    %c0_12 = arith.constant 0 : index
    %c0_13 = arith.constant 0 : index
    %c0_14 = arith.constant 0 : index
    %18 = vector.load %arg4[%c0_12, %c0_13, %c0_14] : memref<2x32x64xbf16, #tpu.memory_space<vmem>>, vector<1x32x64xbf16>
    %19 = vector.shape_cast %18 : vector<1x32x64xbf16> to vector<32x64xbf16>
    %20 = arith.truncf %17 : vector<64x128xf32> to vector<64x128xbf16>
    %cst_15 = arith.constant dense<0.000000e+00> : vector<32x128xf32>
    %21 = tpu.matmul %19, %20, %cst_15 {dimension_numbers = #tpu.dot_dimension_numbers<[1], [0], [0], [1], [0, 0, 1, 1], [], []>} : vector<32x64xbf16>, vector<64x128xbf16>, vector<32x128xf32> -> vector<32x128xf32>
    %c0_16 = arith.constant 0 : index
    %c0_17 = arith.constant 0 : index
    %c0_18 = arith.constant 0 : index
    %22 = vector.load %arg5[%c0_16, %c0_17, %c0_18] : memref<2x32x1xf32, #tpu.memory_space<vmem>>, vector<1x32x1xf32>
    %23 = vector.shape_cast %22 : vector<1x32x1xf32> to vector<32x1xf32>
    %24 = vector.broadcast %23 : vector<32x1xf32> to vector<32x128xf32>
    %25 = arith.addf %21, %24 : vector<32x128xf32>
    %cst_19 = arith.constant 0.000000e+00 : f32
    %26 = vector.broadcast %cst_19 : f32 to vector<32x128xf32>
    %27 = arith.cmpf ogt, %25, %26 : vector<32x128xf32>
    %cst_20 = arith.constant 0.00999999977 : f32
    %28 = vector.broadcast %cst_20 : f32 to vector<32x128xf32>
    %29 = arith.mulf %28, %25 : vector<32x128xf32>
    %30 = arith.select %27, %25, %29 : vector<32x128xi1>, vector<32x128xf32>
    %c0_21 = arith.constant 0 : index
    %c0_22 = arith.constant 0 : index
    %c0_23 = arith.constant 0 : index
    %31 = vector.load %arg6[%c0_21, %c0_22, %c0_23] : memref<2x32x32xbf16, #tpu.memory_space<vmem>>, vector<1x32x32xbf16>
    %32 = vector.shape_cast %31 : vector<1x32x32xbf16> to vector<32x32xbf16>
    %33 = arith.truncf %30 : vector<32x128xf32> to vector<32x128xbf16>
    %cst_24 = arith.constant dense<0.000000e+00> : vector<32x128xf32>
    %34 = tpu.matmul %32, %33, %cst_24 {dimension_numbers = #tpu.dot_dimension_numbers<[1], [0], [0], [1], [0, 0, 1, 1], [], []>} : vector<32x32xbf16>, vector<32x128xbf16>, vector<32x128xf32> -> vector<32x128xf32>
    %c0_25 = arith.constant 0 : index
    %c0_26 = arith.constant 0 : index
    %c0_27 = arith.constant 0 : index
    %35 = vector.load %arg7[%c0_25, %c0_26, %c0_27] : memref<2x32x1xf32, #tpu.memory_space<vmem>>, vector<1x32x1xf32>
    %36 = vector.shape_cast %35 : vector<1x32x1xf32> to vector<32x1xf32>
    %37 = vector.broadcast %36 : vector<32x1xf32> to vector<32x128xf32>
    %38 = arith.addf %34, %37 : vector<32x128xf32>
    %cst_28 = arith.constant 0.000000e+00 : f32
    %39 = vector.broadcast %cst_28 : f32 to vector<32x128xf32>
    %40 = arith.cmpf ogt, %38, %39 : vector<32x128xf32>
    %cst_29 = arith.constant 0.00999999977 : f32
    %41 = vector.broadcast %cst_29 : f32 to vector<32x128xf32>
    %42 = arith.mulf %41, %38 : vector<32x128xf32>
    %43 = arith.select %40, %38, %42 : vector<32x128xi1>, vector<32x128xf32>
    %c0_30 = arith.constant 0 : index
    %c0_31 = arith.constant 0 : index
    %c0_32 = arith.constant 0 : index
    %44 = vector.load %arg8[%c0_30, %c0_31, %c0_32] : memref<2x16x32xbf16, #tpu.memory_space<vmem>>, vector<1x16x32xbf16>
    %45 = vector.shape_cast %44 : vector<1x16x32xbf16> to vector<16x32xbf16>
    %46 = arith.truncf %43 : vector<32x128xf32> to vector<32x128xbf16>
    %cst_33 = arith.constant dense<0.000000e+00> : vector<16x128xf32>
    %47 = tpu.matmul %45, %46, %cst_33 {dimension_numbers = #tpu.dot_dimension_numbers<[1], [0], [0], [1], [0, 0, 1, 1], [], []>} : vector<16x32xbf16>, vector<32x128xbf16>, vector<16x128xf32> -> vector<16x128xf32>
    %c0_34 = arith.constant 0 : index
    %c0_35 = arith.constant 0 : index
    %c0_36 = arith.constant 0 : index
    %48 = vector.load %arg9[%c0_34, %c0_35, %c0_36] : memref<2x16x1xf32, #tpu.memory_space<vmem>>, vector<1x16x1xf32>
    %49 = vector.shape_cast %48 : vector<1x16x1xf32> to vector<16x1xf32>
    %50 = vector.broadcast %49 : vector<16x1xf32> to vector<16x128xf32>
    %51 = arith.addf %47, %50 : vector<16x128xf32>
    %cst_37 = arith.constant 0.000000e+00 : f32
    %52 = vector.broadcast %cst_37 : f32 to vector<16x128xf32>
    %53 = arith.cmpf ogt, %51, %52 : vector<16x128xf32>
    %cst_38 = arith.constant 0.00999999977 : f32
    %54 = vector.broadcast %cst_38 : f32 to vector<16x128xf32>
    %55 = arith.mulf %54, %51 : vector<16x128xf32>
    %56 = arith.select %53, %51, %55 : vector<16x128xi1>, vector<16x128xf32>
    %c0_39 = arith.constant 0 : index
    %c0_40 = arith.constant 0 : index
    %c0_41 = arith.constant 0 : index
    %57 = vector.load %arg10[%c0_39, %c0_40, %c0_41] : memref<2x16x16xbf16, #tpu.memory_space<vmem>>, vector<1x16x16xbf16>
    %58 = vector.shape_cast %57 : vector<1x16x16xbf16> to vector<16x16xbf16>
    %59 = arith.truncf %56 : vector<16x128xf32> to vector<16x128xbf16>
    %cst_42 = arith.constant dense<0.000000e+00> : vector<16x128xf32>
    %60 = tpu.matmul %58, %59, %cst_42 {dimension_numbers = #tpu.dot_dimension_numbers<[1], [0], [0], [1], [0, 0, 1, 1], [], []>} : vector<16x16xbf16>, vector<16x128xbf16>, vector<16x128xf32> -> vector<16x128xf32>
    %c0_43 = arith.constant 0 : index
    %c0_44 = arith.constant 0 : index
    %c0_45 = arith.constant 0 : index
    %61 = vector.load %arg11[%c0_43, %c0_44, %c0_45] : memref<2x16x1xf32, #tpu.memory_space<vmem>>, vector<1x16x1xf32>
    %62 = vector.shape_cast %61 : vector<1x16x1xf32> to vector<16x1xf32>
    %63 = vector.broadcast %62 : vector<16x1xf32> to vector<16x128xf32>
    %64 = arith.addf %60, %63 : vector<16x128xf32>
    %cst_46 = arith.constant 0.000000e+00 : f32
    %65 = vector.broadcast %cst_46 : f32 to vector<16x128xf32>
    %66 = arith.cmpf ogt, %64, %65 : vector<16x128xf32>
    %cst_47 = arith.constant 0.00999999977 : f32
    %67 = vector.broadcast %cst_47 : f32 to vector<16x128xf32>
    %68 = arith.mulf %67, %64 : vector<16x128xf32>
    %69 = arith.select %66, %64, %68 : vector<16x128xi1>, vector<16x128xf32>
    %c0_48 = arith.constant 0 : index
    %c0_49 = arith.constant 0 : index
    %c0_50 = arith.constant 0 : index
    %70 = vector.load %arg12[%c0_48, %c0_49, %c0_50] : memref<2x6x16xbf16, #tpu.memory_space<vmem>>, vector<1x6x16xbf16>
    %71 = vector.shape_cast %70 : vector<1x6x16xbf16> to vector<6x16xbf16>
    %72 = arith.truncf %69 : vector<16x128xf32> to vector<16x128xbf16>
    %cst_51 = arith.constant dense<0.000000e+00> : vector<6x128xf32>
    %73 = tpu.matmul %71, %72, %cst_51 {dimension_numbers = #tpu.dot_dimension_numbers<[1], [0], [0], [1], [0, 0, 1, 1], [], []>} : vector<6x16xbf16>, vector<16x128xbf16>, vector<6x128xf32> -> vector<6x128xf32>
    %c0_52 = arith.constant 0 : index
    %c0_53 = arith.constant 0 : index
    %c0_54 = arith.constant 0 : index
    %74 = vector.load %arg13[%c0_52, %c0_53, %c0_54] : memref<2x6x1xf32, #tpu.memory_space<vmem>>, vector<1x6x1xf32>
    %75 = vector.shape_cast %74 : vector<1x6x1xf32> to vector<6x1xf32>
    %76 = vector.broadcast %75 : vector<6x1xf32> to vector<6x128xf32>
    %77 = arith.addf %73, %76 : vector<6x128xf32>
    %78 = vector.extract_strided_slice %77 {offsets = [0, 0], sizes = [3, 128], strides = [1, 1]} : vector<6x128xf32> to vector<3x128xf32>
    %cst_55 = arith.constant -1.000000e+01 : f32
    %cst_56 = arith.constant 1.000000e+01 : f32
    %79 = vector.broadcast %cst_55 : f32 to vector<3x128xf32>
    %80 = arith.maximumf %79, %78 : vector<3x128xf32>
    %81 = vector.broadcast %cst_56 : f32 to vector<3x128xf32>
    %82 = arith.minimumf %81, %80 : vector<3x128xf32>
    %83 = vector.extract_strided_slice %77 {offsets = [3, 0], sizes = [3, 128], strides = [1, 1]} : vector<6x128xf32> to vector<3x128xf32>
    %84 = arith.subf %0, %83 : vector<3x128xf32>
    %cst_57 = arith.constant 0.000000e+00 : f32
    %85 = vector.broadcast %cst_57 : f32 to vector<3x128xf32>
    %86 = arith.subf %85, %82 : vector<3x128xf32>
    %87 = math.exp %86 : vector<3x128xf32>
    %88 = arith.mulf %84, %87 : vector<3x128xf32>
    %89 = tpu.iota {dimensions = array<i32: 0>} : vector<3x128xi32>
    %c0_i32 = arith.constant 0 : i32
    %90 = vector.broadcast %c0_i32 : i32 to vector<3x128xi32>
    %91 = arith.cmpi eq, %89, %90 : vector<3x128xi32>
    %92 = arith.select %91, %0, %88 : vector<3x128xi1>, vector<3x128xf32>
    %c1 = arith.constant 1 : index
    %c0_58 = arith.constant 0 : index
    %c0_59 = arith.constant 0 : index
    %93 = vector.load %arg3[%c1, %c0_58, %c0_59] : memref<2x64x1xf32, #tpu.memory_space<vmem>>, vector<1x64x1xf32>
    %94 = vector.shape_cast %93 : vector<1x64x1xf32> to vector<64x1xf32>
    %95 = vector.extract_strided_slice %92 {offsets = [1, 0], sizes = [1, 128], strides = [1, 1]} : vector<3x128xf32> to vector<1x128xf32>
    %96 = vector.broadcast %94 : vector<64x1xf32> to vector<64x128xf32>
    %97 = vector.broadcast %95 : vector<1x128xf32> to vector<64x128xf32>
    %98 = arith.mulf %96, %97 : vector<64x128xf32>
    %c0_60 = arith.constant 0 : index
    %c0_61 = arith.constant 0 : index
    %c1_62 = arith.constant 1 : index
    %99 = vector.load %arg1[%c0_60, %c0_61, %c1_62] : memref<1x64x2xf32, #tpu.memory_space<vmem>>, vector<1x64x1xf32>
    %100 = vector.shape_cast %99 : vector<1x64x1xf32> to vector<64x1xf32>
    %101 = vector.broadcast %100 : vector<64x1xf32> to vector<64x128xf32>
    %102 = arith.addf %98, %101 : vector<64x128xf32>
    %c0_63 = arith.constant 0 : index
    %c0_64 = arith.constant 0 : index
    %103 = vector.load %arg15[%c0_63, %c0_64] : memref<64x128xf32, #tpu.memory_space<vmem>>, vector<64x128xf32>
    tpu.vector_store %arg15[%c0_63, %c0_64], %102 {strides = array<i32>} : memref<64x128xf32, #tpu.memory_space<vmem>>, vector<64x128xf32>,
    %c0_65 = arith.constant 0 : index
    %c0_66 = arith.constant 0 : index
    %104 = vector.load %arg15[%c0_65, %c0_66] : memref<64x128xf32, #tpu.memory_space<vmem>>, vector<64x128xf32>
    %cst_67 = arith.constant 0.000000e+00 : f32
    %105 = vector.broadcast %cst_67 : f32 to vector<64x128xf32>
    %106 = arith.cmpf ogt, %104, %105 : vector<64x128xf32>
    %cst_68 = arith.constant 0.00999999977 : f32
    %107 = vector.broadcast %cst_68 : f32 to vector<64x128xf32>
    %108 = arith.mulf %107, %104 : vector<64x128xf32>
    %109 = arith.select %106, %104, %108 : vector<64x128xi1>, vector<64x128xf32>
    %c1_69 = arith.constant 1 : index
    %c0_70 = arith.constant 0 : index
    %c0_71 = arith.constant 0 : index
    %110 = vector.load %arg4[%c1_69, %c0_70, %c0_71] : memref<2x32x64xbf16, #tpu.memory_space<vmem>>, vector<1x32x64xbf16>
    %111 = vector.shape_cast %110 : vector<1x32x64xbf16> to vector<32x64xbf16>
    %112 = arith.truncf %109 : vector<64x128xf32> to vector<64x128xbf16>
    %cst_72 = arith.constant dense<0.000000e+00> : vector<32x128xf32>
    %113 = tpu.matmul %111, %112, %cst_72 {dimension_numbers = #tpu.dot_dimension_numbers<[1], [0], [0], [1], [0, 0, 1, 1], [], []>} : vector<32x64xbf16>, vector<64x128xbf16>, vector<32x128xf32> -> vector<32x128xf32>
    %c1_73 = arith.constant 1 : index
    %c0_74 = arith.constant 0 : index
    %c0_75 = arith.constant 0 : index
    %114 = vector.load %arg5[%c1_73, %c0_74, %c0_75] : memref<2x32x1xf32, #tpu.memory_space<vmem>>, vector<1x32x1xf32>
    %115 = vector.shape_cast %114 : vector<1x32x1xf32> to vector<32x1xf32>
    %116 = vector.broadcast %115 : vector<32x1xf32> to vector<32x128xf32>
    %117 = arith.addf %113, %116 : vector<32x128xf32>
    %cst_76 = arith.constant 0.000000e+00 : f32
    %118 = vector.broadcast %cst_76 : f32 to vector<32x128xf32>
    %119 = arith.cmpf ogt, %117, %118 : vector<32x128xf32>
    %cst_77 = arith.constant 0.00999999977 : f32
    %120 = vector.broadcast %cst_77 : f32 to vector<32x128xf32>
    %121 = arith.mulf %120, %117 : vector<32x128xf32>
    %122 = arith.select %119, %117, %121 : vector<32x128xi1>, vector<32x128xf32>
    %c1_78 = arith.constant 1 : index
    %c0_79 = arith.constant 0 : index
    %c0_80 = arith.constant 0 : index
    %123 = vector.load %arg6[%c1_78, %c0_79, %c0_80] : memref<2x32x32xbf16, #tpu.memory_space<vmem>>, vector<1x32x32xbf16>
    %124 = vector.shape_cast %123 : vector<1x32x32xbf16> to vector<32x32xbf16>
    %125 = arith.truncf %122 : vector<32x128xf32> to vector<32x128xbf16>
    %cst_81 = arith.constant dense<0.000000e+00> : vector<32x128xf32>
    %126 = tpu.matmul %124, %125, %cst_81 {dimension_numbers = #tpu.dot_dimension_numbers<[1], [0], [0], [1], [0, 0, 1, 1], [], []>} : vector<32x32xbf16>, vector<32x128xbf16>, vector<32x128xf32> -> vector<32x128xf32>
    %c1_82 = arith.constant 1 : index
    %c0_83 = arith.constant 0 : index
    %c0_84 = arith.constant 0 : index
    %127 = vector.load %arg7[%c1_82, %c0_83, %c0_84] : memref<2x32x1xf32, #tpu.memory_space<vmem>>, vector<1x32x1xf32>
    %128 = vector.shape_cast %127 : vector<1x32x1xf32> to vector<32x1xf32>
    %129 = vector.broadcast %128 : vector<32x1xf32> to vector<32x128xf32>
    %130 = arith.addf %126, %129 : vector<32x128xf32>
    %cst_85 = arith.constant 0.000000e+00 : f32
    %131 = vector.broadcast %cst_85 : f32 to vector<32x128xf32>
    %132 = arith.cmpf ogt, %130, %131 : vector<32x128xf32>
    %cst_86 = arith.constant 0.00999999977 : f32
    %133 = vector.broadcast %cst_86 : f32 to vector<32x128xf32>
    %134 = arith.mulf %133, %130 : vector<32x128xf32>
    %135 = arith.select %132, %130, %134 : vector<32x128xi1>, vector<32x128xf32>
    %c1_87 = arith.constant 1 : index
    %c0_88 = arith.constant 0 : index
    %c0_89 = arith.constant 0 : index
    %136 = vector.load %arg8[%c1_87, %c0_88, %c0_89] : memref<2x16x32xbf16, #tpu.memory_space<vmem>>, vector<1x16x32xbf16>
    %137 = vector.shape_cast %136 : vector<1x16x32xbf16> to vector<16x32xbf16>
    %138 = arith.truncf %135 : vector<32x128xf32> to vector<32x128xbf16>
    %cst_90 = arith.constant dense<0.000000e+00> : vector<16x128xf32>
    %139 = tpu.matmul %137, %138, %cst_90 {dimension_numbers = #tpu.dot_dimension_numbers<[1], [0], [0], [1], [0, 0, 1, 1], [], []>} : vector<16x32xbf16>, vector<32x128xbf16>, vector<16x128xf32> -> vector<16x128xf32>
    %c1_91 = arith.constant 1 : index
    %c0_92 = arith.constant 0 : index
    %c0_93 = arith.constant 0 : index
    %140 = vector.load %arg9[%c1_91, %c0_92, %c0_93] : memref<2x16x1xf32, #tpu.memory_space<vmem>>, vector<1x16x1xf32>
    %141 = vector.shape_cast %140 : vector<1x16x1xf32> to vector<16x1xf32>
    %142 = vector.broadcast %141 : vector<16x1xf32> to vector<16x128xf32>
    %143 = arith.addf %139, %142 : vector<16x128xf32>
    %cst_94 = arith.constant 0.000000e+00 : f32
    %144 = vector.broadcast %cst_94 : f32 to vector<16x128xf32>
    %145 = arith.cmpf ogt, %143, %144 : vector<16x128xf32>
    %cst_95 = arith.constant 0.00999999977 : f32
    %146 = vector.broadcast %cst_95 : f32 to vector<16x128xf32>
    %147 = arith.mulf %146, %143 : vector<16x128xf32>
    %148 = arith.select %145, %143, %147 : vector<16x128xi1>, vector<16x128xf32>
    %c1_96 = arith.constant 1 : index
    %c0_97 = arith.constant 0 : index
    %c0_98 = arith.constant 0 : index
    %149 = vector.load %arg10[%c1_96, %c0_97, %c0_98] : memref<2x16x16xbf16, #tpu.memory_space<vmem>>, vector<1x16x16xbf16>
    %150 = vector.shape_cast %149 : vector<1x16x16xbf16> to vector<16x16xbf16>
    %151 = arith.truncf %148 : vector<16x128xf32> to vector<16x128xbf16>
    %cst_99 = arith.constant dense<0.000000e+00> : vector<16x128xf32>
    %152 = tpu.matmul %150, %151, %cst_99 {dimension_numbers = #tpu.dot_dimension_numbers<[1], [0], [0], [1], [0, 0, 1, 1], [], []>} : vector<16x16xbf16>, vector<16x128xbf16>, vector<16x128xf32> -> vector<16x128xf32>
    %c1_100 = arith.constant 1 : index
    %c0_101 = arith.constant 0 : index
    %c0_102 = arith.constant 0 : index
    %153 = vector.load %arg11[%c1_100, %c0_101, %c0_102] : memref<2x16x1xf32, #tpu.memory_space<vmem>>, vector<1x16x1xf32>
    %154 = vector.shape_cast %153 : vector<1x16x1xf32> to vector<16x1xf32>
    %155 = vector.broadcast %154 : vector<16x1xf32> to vector<16x128xf32>
    %156 = arith.addf %152, %155 : vector<16x128xf32>
    %cst_103 = arith.constant 0.000000e+00 : f32
    %157 = vector.broadcast %cst_103 : f32 to vector<16x128xf32>
    %158 = arith.cmpf ogt, %156, %157 : vector<16x128xf32>
    %cst_104 = arith.constant 0.00999999977 : f32
    %159 = vector.broadcast %cst_104 : f32 to vector<16x128xf32>
    %160 = arith.mulf %159, %156 : vector<16x128xf32>
    %161 = arith.select %158, %156, %160 : vector<16x128xi1>, vector<16x128xf32>
    %c1_105 = arith.constant 1 : index
    %c0_106 = arith.constant 0 : index
    %c0_107 = arith.constant 0 : index
    %162 = vector.load %arg12[%c1_105, %c0_106, %c0_107] : memref<2x6x16xbf16, #tpu.memory_space<vmem>>, vector<1x6x16xbf16>
    %163 = vector.shape_cast %162 : vector<1x6x16xbf16> to vector<6x16xbf16>
    %164 = arith.truncf %161 : vector<16x128xf32> to vector<16x128xbf16>
    %cst_108 = arith.constant dense<0.000000e+00> : vector<6x128xf32>
    %165 = tpu.matmul %163, %164, %cst_108 {dimension_numbers = #tpu.dot_dimension_numbers<[1], [0], [0], [1], [0, 0, 1, 1], [], []>} : vector<6x16xbf16>, vector<16x128xbf16>, vector<6x128xf32> -> vector<6x128xf32>
    %c1_109 = arith.constant 1 : index
    %c0_110 = arith.constant 0 : index
    %c0_111 = arith.constant 0 : index
    %166 = vector.load %arg13[%c1_109, %c0_110, %c0_111] : memref<2x6x1xf32, #tpu.memory_space<vmem>>, vector<1x6x1xf32>
    %167 = vector.shape_cast %166 : vector<1x6x1xf32> to vector<6x1xf32>
    %168 = vector.broadcast %167 : vector<6x1xf32> to vector<6x128xf32>
    %169 = arith.addf %165, %168 : vector<6x128xf32>
    %170 = vector.extract_strided_slice %169 {offsets = [0, 0], sizes = [3, 128], strides = [1, 1]} : vector<6x128xf32> to vector<3x128xf32>
    %cst_112 = arith.constant -1.000000e+01 : f32
    %cst_113 = arith.constant 1.000000e+01 : f32
    %171 = vector.broadcast %cst_112 : f32 to vector<3x128xf32>
    %172 = arith.maximumf %171, %170 : vector<3x128xf32>
    %173 = vector.broadcast %cst_113 : f32 to vector<3x128xf32>
    %174 = arith.minimumf %173, %172 : vector<3x128xf32>
    %175 = vector.extract_strided_slice %169 {offsets = [3, 0], sizes = [3, 128], strides = [1, 1]} : vector<6x128xf32> to vector<3x128xf32>
    %176 = arith.subf %92, %175 : vector<3x128xf32>
    %cst_114 = arith.constant 0.000000e+00 : f32
    %177 = vector.broadcast %cst_114 : f32 to vector<3x128xf32>
    %178 = arith.subf %177, %174 : vector<3x128xf32>
    %179 = math.exp %178 : vector<3x128xf32>
    %180 = arith.mulf %176, %179 : vector<3x128xf32>
    %181 = tpu.iota {dimensions = array<i32: 0>} : vector<3x128xi32>
    %c1_i32 = arith.constant 1 : i32
    %182 = vector.broadcast %c1_i32 : i32 to vector<3x128xi32>
    %183 = arith.cmpi eq, %181, %182 : vector<3x128xi32>
    %184 = arith.select %183, %92, %180 : vector<3x128xi1>, vector<3x128xf32>
    %c0_115 = arith.constant 0 : index
    %c0_116 = arith.constant 0 : index
    %185 = vector.load %arg14[%c0_115, %c0_116] : memref<3x128xf32, #tpu.memory_space<vmem>>, vector<3x128xf32>
    tpu.vector_store %arg14[%c0_115, %c0_116], %184 {strides = array<i32>} : memref<3x128xf32, #tpu.memory_space<vmem>>, vector<3x128xf32>,
    return
  }
  func.func @transform_0(%arg0: i32) -> (i32, i32, i32) {
    %c0_i32 = arith.constant 0 : i32
    %c0_i32_0 = arith.constant 0 : i32
    %c0_i32_1 = arith.constant 0 : i32
    return %arg0, %c0_i32, %c0_i32_0 : i32, i32, i32
  }
  func.func @transform_1(%arg0: i32) -> (i32, i32) {
    %c0_i32 = arith.constant 0 : i32
    %c0_i32_0 = arith.constant 0 : i32
    return %c0_i32, %arg0 : i32, i32
  }
  func.func @transform_2(%arg0: i32) -> (i32, i32, i32) {
    %c0_i32 = arith.constant 0 : i32
    %c0_i32_0 = arith.constant 0 : i32
    %c0_i32_1 = arith.constant 0 : i32
    %c0_i32_2 = arith.constant 0 : i32
    return %c0_i32, %c0_i32_0, %c0_i32_1 : i32, i32, i32
  }
  func.func @transform_3(%arg0: i32) -> (i32, i32, i32) {
    %c0_i32 = arith.constant 0 : i32
    %c0_i32_0 = arith.constant 0 : i32
    %c0_i32_1 = arith.constant 0 : i32
    %c0_i32_2 = arith.constant 0 : i32
    return %c0_i32, %c0_i32_0, %c0_i32_1 : i32, i32, i32
  }
  func.func @transform_4(%arg0: i32) -> (i32, i32, i32) {
    %c0_i32 = arith.constant 0 : i32
    %c0_i32_0 = arith.constant 0 : i32
    %c0_i32_1 = arith.constant 0 : i32
    %c0_i32_2 = arith.constant 0 : i32
    return %c0_i32, %c0_i32_0, %c0_i32_1 : i32, i32, i32
  }
  func.func @transform_5(%arg0: i32) -> (i32, i32, i32) {
    %c0_i32 = arith.constant 0 : i32
    %c0_i32_0 = arith.constant 0 : i32
    %c0_i32_1 = arith.constant 0 : i32
    %c0_i32_2 = arith.constant 0 : i32
    return %c0_i32, %c0_i32_0, %c0_i32_1 : i32, i32, i32
  }
  func.func @transform_6(%arg0: i32) -> (i32, i32, i32) {
    %c0_i32 = arith.constant 0 : i32
    %c0_i32_0 = arith.constant 0 : i32
    %c0_i32_1 = arith.constant 0 : i32
    %c0_i32_2 = arith.constant 0 : i32
    return %c0_i32, %c0_i32_0, %c0_i32_1 : i32, i32, i32
  }
  func.func @transform_7(%arg0: i32) -> (i32, i32, i32) {
    %c0_i32 = arith.constant 0 : i32
    %c0_i32_0 = arith.constant 0 : i32
    %c0_i32_1 = arith.constant 0 : i32
    %c0_i32_2 = arith.constant 0 : i32
    return %c0_i32, %c0_i32_0, %c0_i32_1 : i32, i32, i32
  }
  func.func @transform_8(%arg0: i32) -> (i32, i32, i32) {
    %c0_i32 = arith.constant 0 : i32
    %c0_i32_0 = arith.constant 0 : i32
    %c0_i32_1 = arith.constant 0 : i32
    %c0_i32_2 = arith.constant 0 : i32
    return %c0_i32, %c0_i32_0, %c0_i32_1 : i32, i32, i32
  }
  func.func @transform_9(%arg0: i32) -> (i32, i32, i32) {
    %c0_i32 = arith.constant 0 : i32
    %c0_i32_0 = arith.constant 0 : i32
    %c0_i32_1 = arith.constant 0 : i32
    %c0_i32_2 = arith.constant 0 : i32
    return %c0_i32, %c0_i32_0, %c0_i32_1 : i32, i32, i32
  }
  func.func @transform_10(%arg0: i32) -> (i32, i32, i32) {
    %c0_i32 = arith.constant 0 : i32
    %c0_i32_0 = arith.constant 0 : i32
    %c0_i32_1 = arith.constant 0 : i32
    %c0_i32_2 = arith.constant 0 : i32
    return %c0_i32, %c0_i32_0, %c0_i32_1 : i32, i32, i32
  }
  func.func @transform_11(%arg0: i32) -> (i32, i32, i32) {
    %c0_i32 = arith.constant 0 : i32
    %c0_i32_0 = arith.constant 0 : i32
    %c0_i32_1 = arith.constant 0 : i32
    %c0_i32_2 = arith.constant 0 : i32
    return %c0_i32, %c0_i32_0, %c0_i32_1 : i32, i32, i32
  }
  func.func @transform_12(%arg0: i32) -> (i32, i32, i32) {
    %c0_i32 = arith.constant 0 : i32
    %c0_i32_0 = arith.constant 0 : i32
    %c0_i32_1 = arith.constant 0 : i32
    %c0_i32_2 = arith.constant 0 : i32
    return %c0_i32, %c0_i32_0, %c0_i32_1 : i32, i32, i32
  }
  func.func @transform_13(%arg0: i32) -> (i32, i32) {
    %c0_i32 = arith.constant 0 : i32
    %c0_i32_0 = arith.constant 0 : i32
    return %c0_i32, %arg0 : i32, i32
  }
}

</mosaic_0001>

<bundles_post_ra>
// kernel: tpu_custom_call.1
= control target key start
LH: loop header
LB: loop body
LE: loop exit
PB: predicated region body
PF: predicated region fallthrough
CT: control target
= control target key end

     0   :  { %s2475_s0 = inlined_call_operand.vmem [shape: f32[2,64,2], index: 0, kind: input, shape index: {}]   ;;  %s2476_s1 = inlined_call_operand.vmem [shape: f32[3,256], index: 1, kind: input, shape index: {}]   ;;  %s2477_s2 = inlined_call_operand.vmem [shape: f32[2,64,1], index: 2, kind: input, shape index: {}]   ;;  %s2478_s3 = inlined_call_operand.vmem [shape: bf16[2,32,64], index: 3, kind: input, shape index: {}]   ;;  %s2479_s4 = inlined_call_operand.vmem [shape: f32[2,32,1], index: 4, kind: input, shape index: {}]   ;;  %s2480_s5 = inlined_call_operand.vmem [shape: bf16[2,32,32], index: 5, kind: input, shape index: {}]   ;;  %s2481_s6 = inlined_call_operand.vmem [shape: f32[2,32,1], index: 6, kind: input, shape index: {}]   ;;  %s2482_s7 = inlined_call_operand.vmem [shape: bf16[2,16,32], index: 7, kind: input, shape index: {}]   ;;  %s2483_s8 = inlined_call_operand.vmem [shape: f32[2,16,1], index: 8, kind: input, shape index: {}]   ;;  %s2484_s9 = inlined_call_operand.vmem [shape: bf16[2,16,16], index: 9, kind: input, shape index: {}]   ;;  %s2485_s10 = inlined_call_operand.vmem [shape: f32[2,16,1], index: 10, kind: input, shape index: {}]   ;;  %s2486_s11 = inlined_call_operand.vmem [shape: bf16[2,6,16], index: 11, kind: input, shape index: {}]   ;;  %s2487_s12 = inlined_call_operand.vmem [shape: f32[2,6,1], index: 12, kind: input, shape index: {}]   ;;  %s2488_s13 = inlined_call_operand.hbm [shape: f32[3,256], index: 13, kind: output, shape index: {}]  }
   0x1   :  { %2490 = sst [smem:[#allocation8_spill]] %s2475_s0 }
   0x2   :  { %18 = vsyncpa [#allocation4], 0 }
   0x3   :  { %20 = vsyncpa [#allocation4 + $0x1], 0  ;;  %s2111_s25 = smov 0   ;;  %s2113_s26 = smov 0  }
   0x4   :  { %s2115_s27 = smov 0   ;;  %s2117_s28 = smov 0  }
   0x5 LB: > { %2491 = sst [smem:[#allocation6_spill]] %s2030_s27  ;;  %s2132_s29 = sadd.s32 4294967295, %s2034_s28   ;;  %s2034_s28 = sphi %s2117_s28, %s2500_s28   ;;  %s2030_s27 = sphi %s2115_s27, %s2497_s27   ;;  %s2026_s26 = sphi %s2113_s26, %s2499_s26   ;;  %s2022_s25 = sphi %s2111_s25, %s2498_s25  }
   0x6   : > { %s1712_s30 = sadd.s32 4294967294, %s2034_s28   ;;  %s2136_s14 = sadd.s32 1, %s2034_s28  }
   0x7   : > { %s316_s15 = sadd.s32 1, %s2030_s27  ;;  %s313_s16 = ssub.s32 %s2034_s28, %s2136_s14 }
   0x8   : > { %p326_p0 = scmp.ne.s32.totalorder %s2030_s27, %s2026_s26  ;;  %p314_p1 = scmp.eq.s32.totalorder %s313_s16, 0 }
   0x9   : > { %p327_p2 = scmp.eq.s32.totalorder %s2132_s29, 1  ;;  %p332_p3 = scmp.ne.s32.totalorder %s2026_s26, %s2022_s25 }
   0xa   : > { %p333_p4 = scmp.eq.s32.totalorder %s1712_s30, 1  ;;  %p1715_p7 = scmp.ge.s32.totalorder %s2034_s28, 1 }
   0xb   : > { %s2147_s17 = scalar_select %p314_p1, %s2030_s27, %s316_s15  }
   0xc   : > { %p2149_p5 = por %p327_p2, %p326_p0  ;;  %p2153_p6 = por %p333_p4, %p332_p3 }
   0xd   : > { %2492 = sst [smem:[#allocation7_spill]] %s2147_s17  ;;  %p399_p8 = scmp.lt.s32.totalorder %s2034_s28, 3 }
   0xf   : > { %p400_p9 = pnand %p1715_p7, %p399_p8 }
  0x10   : > { %v458_v0 = vld [vmem:[%s2477_s2] sm:$0xff] (!%p400_p9)  ;;  %p447_p10 = scmp.lt.s32.totalorder (!%p400_p9), %s2132_s29, 1  ;;  %v2036_v1 = vmov (!%p400_p9), 0   ;;  %v459_v2 = vld [vmem:[%s2477_s2 + $0x8] sm:$0xff] (!%p400_p9)  ;;  %s2495_s0 = sld [smem:[#allocation8_spill]] (!%p400_p9)  ;;  %v460_v4 = vld [vmem:[%s2477_s2 + $0x10] sm:$0xff] (!%p400_p9)  ;;  %v506_v34 = vlaneseq (!%p400_p9) }
  0x11   : > { %403 = sbr.rel (%p400_p9) target bundleno = 2520 (0x9d8), region = 72  ;;  %1944 = vset.pattern.permute.xlu0 (!%p400_p9), %v2036_v1  ;;  %1945 = vset.pattern.permute.xlu1 (!%p400_p9), %v2036_v1  ;;  %v461_v7 = vld [vmem:[%s2477_s2 + $0x18] sm:$0xff] (!%p400_p9)  ;;  %v462_v8 = vld [vmem:[%s2477_s2 + $0x20] sm:$0xff] (!%p400_p9)  ;;  %v463_v11 = vld [vmem:[%s2477_s2 + $0x28] sm:$0xff] (!%p400_p9)  ;;  %vm656_vm0 = vcmask (!%p400_p9), 523264   ;;  %vm764_vm9 = vcmask (!%p400_p9), 261120  }
  0x12   : > { %468 = vperm.xlu0 (!%p400_p9), %1944, %v458_v0   ;;  %v464_v12 = vld [vmem:[%s2477_s2 + $0x30] sm:$0xff] (!%p400_p9)  ;;  %v465_v15 = vld [vmem:[%s2477_s2 + $0x38] sm:$0xff] (!%p400_p9)  ;;  %v622_v16 = vld [vmem:[%s2479_s4] sm:$0xff] (!%p400_p9)  ;;  %v2270_v35 = vshrl.u32 (!%p400_p9), %v506_v34, 7  ;;  %vm2038_vm14 = vmmov (!%p400_p9), 0   ;;  %s1783_s24 = sshll.u32 (!%p400_p9), %s2132_s29, 6 }
  0x13   : > { %v624_v18 = vld [vmem:[%s2479_s4 + $0x10] sm:$0xff] (!%p400_p9)  ;;  %v623_v19 = vld [vmem:[%s2479_s4 + $0x8] sm:$0xff] (!%p400_p9)  ;;  %v730_v20 = vld [vmem:[%s2481_s6] sm:$0xff] (!%p400_p9)  ;;  %s2040_s16 = smov (!%p400_p9), [#allocation3]  }
  0x14   : > { %v625_v21 = vld [vmem:[%s2479_s4 + $0x18] sm:$0xff] (!%p400_p9)  ;;  %v732_v22 = vld [vmem:[%s2481_s6 + $0x10] sm:$0xff] (!%p400_p9)  ;;  %v1956_v23 = vld [vmem:[%s2478_s3] sm:$0xff] (!%p400_p9)   ;;  %v508_v36 = vsub.s32 (!%p400_p9), 0, %v2270_v35  ;;  %s1976_s21 = sshll.u32 (!%p400_p9), %s2040_s16, 4  ;;  %s1977_s21 = int_to_ptr.vmem [resolvable:$false] %s1976_s21 }
  0x15   : > { %v731_v24 = vld [vmem:[%s2481_s6 + $0x8] sm:$0xff] (!%p400_p9)  ;;  %1829 = vmatprep.mubr.msk.bf16.mxu0 (!%p400_p9), %vm656_vm0, %v1956_v23  ;;  %v836_v25 = vld [vmem:[%s2483_s8] sm:$0xff] (!%p400_p9)  ;;  %v733_v26 = vld [vmem:[%s2481_s6 + $0x18] sm:$0xff] (!%p400_p9) }
  0x16   : > { %473 = vperm.xlu0 (!%p400_p9), %1944, %v459_v2   ;;  %v906_v27 = vld [vmem:[%s2485_s10] sm:$0xff] (!%p400_p9)  ;;  %v837_v28 = vld [vmem:[%s2483_s8 + $0x8] sm:$0xff] (!%p400_p9) }
  0x17   : > { %v976_v29 = vld [vmem:[%s2487_s12] sm:$0x3f] (!%p400_p9)  ;;  %v907_v30 = vld [vmem:[%s2485_s10 + $0x8] sm:$0xff] (!%p400_p9) }
  0x18   : > { %s2166_s22 = scalar_select %p447_p10, %s2132_s29, 1  ;;  %v1735_v31 = vld [vmem:[%s2477_s2 + $0x48] sm:$0xff]  ;;  %v1734_v32 = vld [vmem:[%s2477_s2 + $0x40] sm:$0xff] }
  0x19   : > { %v1738_v33 = vld [vmem:[%s2477_s2 + $0x60] sm:$0xff] }
  0x1a   : > { %s1786_s30 = sshll.u32 %s2166_s22, 6  ;;  %478 = vperm.xlu0 %1944, %v460_v4  }
  0x1b   : > { %s451_s20 = scalar_lea.vmem %s2495_s0, %s1786_s30  ;;  %s1719_s0 = sshll.u32 %s2166_s22, 2 }
  0x1c   : > { %v2175_v3 = vld [vmem:[%s451_s20] sm:$0xff]  ;;  %v2181_v5 = vld [vmem:[%s451_s20 + $0x8] sm:$0xff]  ;;  %v2183_v6 = vld [vmem:[%s451_s20 + $0x10] sm:$0xff]  ;;  %s455_s30 = scalar_lea.vmem %s2476_s1, %s1719_s0  ;;  %s444_s0 = sand.u32 1, %s2026_s26  }
  0x1d   : > { %528 = vperm.xlu1 %1945, %v2175_v3   ;;  %v2193_v9 = vld [vmem:[%s451_s20 + $0x18] sm:$0xff]  ;;  %v2196_v10 = vld [vmem:[%s451_s20 + $0x20] sm:$0xff]  ;;  %v2205_v13 = vld [vmem:[%s451_s20 + $0x28] sm:$0xff]  ;;  %s1716_s23 = sshll.u32 %s444_s0, 2  ;;  %s1628_s29 = scalar_lea.sflag [#allocation4], %s444_s0 }
  0x1e   : > { %538 = vperm.xlu0 %1944, %v2183_v6   ;;  %v2208_v14 = vld [vmem:[%s451_s20 + $0x30] sm:$0xff]  ;;  %v2217_v17 = vld [vmem:[%s451_s20 + $0x38] sm:$0xff]  ;;  %v2276_v37 = vld [vmem:[%s455_s30] sm:$0x7]  ;;  %s446_s30 = scalar_lea.vmem [#allocation3], %s1716_s23  ;;  %s2432_s20 = scalar_lea.hbm %s2488_s13, %s1783_s24 }
  0x1f   : > { %v509_v38 = vrot.slane %v2276_v37, %v508_v36  ;;  %s1641_s22 = sshll.u32 %s446_s30, 4  ;;  %s1978_s23 = scalar_lea.vmem %s1977_s21, 128  ;;  %s2434_s22 = int_to_ptr.vmem [resolvable:$true] %s1641_s22 }
  0x20   : > { %s1972_s17 = scalar_lea.vmem %s2434_s22, 64  ;;  %p1979_p0 = scmp.lt.s32.totalorder %s2434_s22, %s1977_s21 }
  0x21   : > { %533 = vperm.xlu1 %1945, %v2181_v5   ;;  %p1973_p11 = scmp.ne.s32.totalorder %s2434_s22, %s1972_s17  ;;  %p1980_p1 = scmp.lt.s32.totalorder %s1978_s23, %s1972_s17 }
  0x22   : > { %488 = vperm.xlu0 %1944, %v462_v8  }
  0x23   : > { %p1974_p12 = pnand %p1973_p11, %p2149_p5  ;;  %p1981_p2 = por %p1980_p1, %p1979_p0 }
  0x25   : > { %483 = vperm.xlu1 %1945, %v461_v7   ;;  %p1975_p13 = pneg %p1974_p12 }
  0x26   : > { %548 = vperm.xlu0 %1944, %v2196_v10  }
  0x27   : > { %p1982_p3 = pnand %p1981_p2, %p1975_p13 }
  0x29   : > { %543 = vperm.xlu1 %1945, %v2193_v9  }
  0x2a   : > { %498 = vperm.xlu0 %1944, %v464_v12  }
  0x2d   : > { %493 = vperm.xlu1 %1945, %v463_v11  }
  0x2e   : > { %558 = vperm.xlu0 %1944, %v2208_v14  }
  0x31   : > { %553 = vperm.xlu1 %1945, %v2205_v13  }
  0x32   : > { %628 = vperm.xlu0 %1944, %v622_v16  }
  0x35   : > { %503 = vperm.xlu1 %1945, %v465_v15  }
  0x36   : > { %638 = vperm.xlu0 %1944, %v624_v18  }
  0x39   : > { %563 = vperm.xlu1 %1945, %v2217_v17  }
  0x3a   : > { %736 = vperm.xlu0 %1944, %v730_v20  }
  0x3d   : > { %633 = vperm.xlu1 %1945, %v623_v19  }
  0x3e   : > { %746 = vperm.xlu0 %1944, %v732_v22  }
  0x41   : > { %643 = vperm.xlu1 %1945, %v625_v21  }
  0x42   : > { %840 = vperm.xlu0 %1944, %v836_v25  }
  0x45   : > { %741 = vperm.xlu1 %1945, %v731_v24  }
  0x46   : > { %910 = vperm.xlu0 %1944, %v906_v27  }
  0x49   : > { %751 = vperm.xlu1 %1945, %v733_v26  }
  0x4a   : > { %979 = vperm.xlu0 %1944, %v976_v29  }
  0x4d   : > { %845 = vperm.xlu1 %1945, %v837_v28  }
  0x4e   : > { %1055 = vperm.xlu0 %1944, %v1735_v31  }
  0x51   : > { %915 = vperm.xlu1 %1945, %v907_v30  }
  0x52   : > { %1070 = vperm.xlu0 %1944, %v1738_v33  }
  0x55   : > { %1050 = vperm.xlu1 %1945, %v1734_v32  }
  0x91   : > { %v469_v39 = vpop.permute.xlu0 %468 }
  0x92   : > { %v510_v40 = vmul.f32 %v509_v38, %v469_v39  ;;  %v1957_v39 = vld [vmem:[%s2478_s3 + $0x8] sm:$0xff]  }
  0x95   : > { %v474_v41 = vpop.permute.xlu0 %473 }
  0x96   : > { %v511_v44 = vmul.f32 %v509_v38, %v474_v41 }
  0x99   : > { %v479_v45 = vpop.permute.xlu0 %478 }
  0x9a   : > { %v512_v49 = vmul.f32 %v509_v38, %v479_v45 }
  0x9c   : > { %v529_v42 = vpop.permute.xlu1 %528 }
  0x9d   : > { %v566_v43 = vadd.f32 %v529_v42, %v510_v40  ;;  %v539_v51 = vpop.permute.xlu0 %538 }
  0x9e   : > { %v568_v53 = vadd.f32 %v539_v51, %v512_v49 }
  0x9f   : > { %v598_v47 = vmul.f32 0.01, %v566_v43  ;;  %vm590_vm1 = vcmp.gt.f32.partialorder %v566_v43, 0.0 }
  0xa0   : > { %v534_v46 = vpop.permute.xlu1 %533  ;;  %v600_v60 = vmul.f32 0.01, %v568_v53  ;;  %vm592_vm3 = vcmp.gt.f32.partialorder %v568_v53, 0.0 }
  0xa1   : > { %v567_v48 = vadd.f32 %v534_v46, %v511_v44  ;;  %v606_v54 = vsel %vm590_vm1, %v566_v43, %v598_v47  ;;  %v489_v58 = vpop.permute.xlu0 %488 }
  0xa2   : > { %v514_v62 = vmul.f32 %v509_v38, %v489_v58  ;;  %v608_v7 = vsel %vm592_vm3, %v568_v53, %v600_v60 }
  0xa3   : > { %v599_v50 = vmul.f32 0.01, %v567_v48  ;;  %vm591_vm2 = vcmp.gt.f32.partialorder %v567_v48, 0.0 }
  0xa4   : > { %v484_v52 = vpop.permute.xlu1 %483 }
  0xa5   : > { %v607_v55 = vsel %vm591_vm2, %v567_v48, %v599_v50  ;;  %v513_v57 = vmul.f32 %v509_v38, %v484_v52  ;;  %v549_v0 = vpop.permute.xlu0 %548 }
  0xa6   : > { %v618_v56 = vpack.c.bf16 %v607_v55, %v606_v54  ;;  %v570_v4 = vadd.f32 %v549_v0, %v514_v62  ;;  %v1959_v62 = vld [vmem:[%s2480_s5 + $0x8] sm:$0xff]  }
  0xa8   : > { %1821 = vmatprep.subr.bf16.mxu0 %v618_v56  ;;  %v544_v59 = vpop.permute.xlu1 %543  ;;  %v602_v18 = vmul.f32 0.01, %v570_v4  ;;  %vm594_vm5 = vcmp.gt.f32.partialorder %v570_v4, 0.0 }
  0xa9   : > { %v569_v61 = vadd.f32 %v544_v59, %v513_v57  ;;  %1822 = vmatpush3.bf16.msra.mxu0 %v618_v56  ;;  %v499_v15 = vpop.permute.xlu0 %498 }
  0xaa   : > { %v516_v20 = vmul.f32 %v509_v38, %v499_v15  ;;  %v610_v25 = vsel %vm594_vm5, %v570_v4, %v602_v18 }
  0xab   : > { %vm593_vm4 = vcmp.gt.f32.partialorder %v569_v61, 0.0  ;;  %v601_v63 = vmul.f32 0.01, %v569_v61 }
  0xac   : > { %v494_v2 = vpop.permute.xlu1 %493 }
  0xad   : > { %v609_v8 = vsel %vm593_vm4, %v569_v61, %v601_v63  ;;  %v515_v12 = vmul.f32 %v509_v38, %v494_v2  ;;  %v559_v22 = vpop.permute.xlu0 %558  ;;  %v2037_v63 = vmov 0.0  }
  0xae   : > { %v619_v11 = vpack.c.bf16 %v609_v8, %v608_v7  ;;  %v572_v24 = vadd.f32 %v559_v22, %v516_v20 }
  0xb0   : > { %1823 = vmatprep.subr.bf16.mxu0 %v619_v11  ;;  %v554_v16 = vpop.permute.xlu1 %553  ;;  %v604_v30 = vmul.f32 0.01, %v572_v24  ;;  %vm596_vm7 = vcmp.gt.f32.partialorder %v572_v24, 0.0 }
  0xb1   : > { %v571_v19 = vadd.f32 %v554_v16, %v515_v12  ;;  %1824 = vmatpush3.bf16.msra.mxu0 %v619_v11  ;;  %v629_v40 = vpop.permute.xlu0 %628 }
  0xb2   : > { %v612_v33 = vsel %vm596_vm7, %v572_v24, %v604_v30 }
  0xb3   : > { %vm595_vm6 = vcmp.gt.f32.partialorder %v571_v19, 0.0  ;;  %v603_v21 = vmul.f32 0.01, %v571_v19 }
  0xb4   : > { %v504_v23 = vpop.permute.xlu1 %503 }
  0xb5   : > { %v611_v26 = vsel %vm595_vm6, %v571_v19, %v603_v21  ;;  %v517_v28 = vmul.f32 %v509_v38, %v504_v23  ;;  %v1958_v38 = vld [vmem:[%s2480_s5] sm:$0xff]   ;;  %v639_v42 = vpop.permute.xlu0 %638  ;;  %vm923_vm6 = vcmask 130048  }
  0xb6   : > { %v620_v27 = vpack.c.bf16 %v611_v26, %v610_v25  ;;  %1837 = vmatprep.mubr.msk.bf16.mxu1 %vm764_vm9, %v1958_v38 }
  0xb8   : > { %1825 = vmatprep.subr.bf16.mxu0 %v620_v27  ;;  %v564_v29 = vpop.permute.xlu1 %563 }
  0xb9   : > { %v573_v31 = vadd.f32 %v564_v29, %v517_v28  ;;  %1826 = vmatpush3.bf16.msra.mxu0 %v620_v27  ;;  %v737_v0 = vpop.permute.xlu0 %736 }
  0xbb   : > { %vm597_vm8 = vcmp.gt.f32.partialorder %v573_v31, 0.0  ;;  %v605_v32 = vmul.f32 0.01, %v573_v31 }
  0xbc   : > { %v634_v41 = vpop.permute.xlu1 %633 }
  0xbd   : > { %v613_v34 = vsel %vm597_vm8, %v573_v31, %v605_v32  ;;  %v747_v4 = vpop.permute.xlu0 %746  ;;  %v1960_v31 = vld [vmem:[%s2482_s7] sm:$0xff]  }
  0xbe   : > { %v621_v36 = vpack.c.bf16 %v613_v34, %v612_v33 }
  0xc0   : > { %1827 = vmatprep.subr.bf16.mxu0 %v621_v36  ;;  %v644_v46 = vpop.permute.xlu1 %643 }
  0xc1   : > { %1828 = vmatpush3.bf16.msra.mxu0 %v621_v36  ;;  %v841_v32 = vpop.permute.xlu0 %840 }
  0xc2   : > { %1849 = vmatprep.subr.bf16.mxu0 %v2037_v63 }
  0xc4   : > { %1830 = vmatmul.mubr.msk.bf16.vlgmr.msra.gmra.mrb[0].mxu0 %vm656_vm0, %v1957_v39  ;;  %v742_v2 = vpop.permute.xlu1 %741 }
  0xc5   : > { %1851 = vmatprep.mubr.msk.bf16.mxu0 %vm2038_vm14, %v2037_v63 }
  0xc8   : > { %v752_v12 = vpop.permute.xlu1 %751 }
  0xcc   : > { %v846_v39 = vpop.permute.xlu1 %845 }
 0x197   : > { %v1831_v43 = vpop.f32.mrb[0].mxu0 }
 0x198   : > { %v706_v44 = vadd.f32 %v1831_v43, %v639_v42  ;;  %v697_v45 = vpop.f32.mrb[1].mxu0 }
 0x199   : > { %v698_v47 = vadd.f32 %v697_v45, %v629_v40  ;;  %v1832_v48 = vpop.f32.mrb[2].mxu0 }
 0x19a   : > { %v718_v49 = vmul.f32 0.01, %v706_v44  ;;  %v709_v50 = vadd.f32 %v1832_v48, %v644_v46  ;;  %v700_v51 = vpop.f32.mrb[3].mxu0  ;;  %vm714_vm10 = vcmp.gt.f32.partialorder %v706_v44, 0.0  ;;  %v2039_v48 = vmov 1  }
 0x19b   : > { %v716_v52 = vmul.f32 0.01, %v698_v47  ;;  %v701_v53 = vadd.f32 %v700_v51, %v634_v41  ;;  %vm712_vm12 = vcmp.gt.f32.partialorder %v698_v47, 0.0  ;;  %1946 = vset.pattern.permute.xlu1 %v2039_v48  ;;  %1949 = vset.pattern.permute.xlu0 %v2039_v48  ;;  %v916_v51 = vpop.permute.xlu1 %915 }
 0x19c   : > { %vm715_vm11 = vcmp.gt.f32.partialorder %v709_v50, 0.0  ;;  %v719_v54 = vmul.f32 0.01, %v709_v50  ;;  %v722_v56 = vsel %vm714_vm10, %v706_v44, %v718_v49  ;;  %1110 = vperm.xlu1 %1946, %v2175_v3   ;;  %1115 = vperm.xlu0 %1949, %v2181_v5   ;;  %v1736_v49 = vld [vmem:[%s2477_s2 + $0x50] sm:$0xff]  ;;  %v1739_v3 = vld [vmem:[%s2477_s2 + $0x68] sm:$0xff]  ;;  %vm1037_vm10 = vcmp.eq.s32.totalorder %v2270_v35, 0 }
 0x19d   : > { %v717_v55 = vmul.f32 0.01, %v701_v53  ;;  %vm713_vm13 = vcmp.gt.f32.partialorder %v701_v53, 0.0  ;;  %v720_v58 = vsel %vm712_vm12, %v698_v47, %v716_v52  ;;  %v1961_v47 = vld [vmem:[%s2484_s9] sm:$0xff]   ;;  %v1740_v5 = vld [vmem:[%s2477_s2 + $0x70] sm:$0xff] }
 0x19e   : > { %v723_v57 = vsel %vm715_vm11, %v709_v50, %v719_v54  ;;  %v1737_v50 = vld [vmem:[%s2477_s2 + $0x58] sm:$0xff] }
 0x19f   : > { %v721_v59 = vsel %vm713_vm13, %v701_v53, %v717_v55  ;;  %v729_v60 = vpack.c.bf16 %v723_v57, %v722_v56 }
 0x1a0   : > { %v728_v61 = vpack.c.bf16 %v721_v59, %v720_v58  ;;  %1947 = vset.pattern.permute.xlu1 %v2036_v1  ;;  %1120 = vperm.xlu0 %1949, %v2183_v6   ;;  %v1741_v6 = vld [vmem:[%s2477_s2 + $0x78] sm:$0xff] }
 0x1a1   : > { %1060 = vperm.xlu1 %1947, %v1736_v49  }
 0x1a2   : > { %1833 = vmatprep.subr.bf16.mxu1 %v728_v61 }
 0x1a3   : > { %1834 = vmatpush3.bf16.msra.mxu1 %v728_v61  ;;  %v1746_v61 = vld [vmem:[%s2479_s4 + $0x20] sm:$0xff] }
 0x1a4   : > { %1835 = vmatprep.subr.bf16.mxu1 %v729_v60  ;;  %1135 = vperm.xlu0 %1949, %v2205_v13  }
 0x1a5   : > { %1065 = vperm.xlu1 %1947, %v1737_v50  }
 0x1a7   : > { %1836 = vmatpush3.bf16.msra.mxu1 %v729_v60  ;;  %v1747_v60 = vld [vmem:[%s2479_s4 + $0x28] sm:$0xff] }
 0x1a8   : > { %1841 = vmatprep.subr.bf16.mxu1 %v2037_v63  ;;  %1140 = vperm.xlu0 %1949, %v2208_v14  }
 0x1a9   : > { %1948 = vset.pattern.permute.xlu1 %v2039_v48 }
 0x1aa   : > { %1838 = vmatmul.mubr.msk.bf16.vlgmr.msra.gmra.mrb[0].mxu1 %vm764_vm9, %v1959_v62  ;;  %1125 = vperm.xlu1 %1948, %v2193_v9   ;;  %v911_v9 = vpop.permute.xlu0 %910  ;;  %v1748_v62 = vld [vmem:[%s2479_s4 + $0x30] sm:$0xff] }
 0x1ab   : > { %1845 = vmatprep.mubr.msk.bf16.mxu1 %vm2038_vm14, %v2037_v63 }
 0x1ac   : > { %1954 = vset.pattern.permute.xlu0 %v2036_v1 }
 0x1ad   : > { %1212 = vperm.xlu0 %1954, %v1746_v61  }
 0x1ae   : > { %1950 = vset.pattern.permute.xlu1 %v2036_v1 }
 0x1af   : > { %1075 = vperm.xlu1 %1950, %v1739_v3  }
 0x1b3   : > { %1951 = vset.pattern.permute.xlu1 %v2039_v48 }
 0x1b4   : > { %1130 = vperm.xlu1 %1951, %v2196_v10  }
 0x1b8   : > { %1952 = vset.pattern.permute.xlu1 %v2036_v1 }
 0x1b9   : > { %1080 = vperm.xlu1 %1952, %v1740_v5  }
 0x1bd   : > { %1085 = vperm.xlu1 %1952, %v1741_v6  }
 0x1c1   : > { %1953 = vset.pattern.permute.xlu1 %v2039_v48 }
 0x1c2   : > { %1145 = vperm.xlu1 %1953, %v2217_v17   ;;  %v1962_v17 = vld [vmem:[%s2478_s3 + $0x10] sm:$0xff]  }
 0x1c6   : > { %1955 = vset.pattern.permute.xlu1 %v2036_v1  ;;  %v974_v1 = vld [vmem:[%s2486_s11] sm:$0x7] }
 0x1c7   : > { %1217 = vperm.xlu1 %1955, %v1747_v60  }
 0x1cb   : > { %1222 = vperm.xlu1 %1955, %v1748_v62  }
 0x27d   : > { %v1839_v7 = vpop.f32.mrb[0].mxu1 }
 0x27e   : > { %v814_v8 = vadd.f32 %v1839_v7, %v747_v4  ;;  %v805_v11 = vpop.f32.mrb[1].mxu1  ;;  %v1759_v4 = vld [vmem:[%s2481_s6 + $0x28] sm:$0xff]  ;;  %v1760_v7 = vld [vmem:[%s2481_s6 + $0x30] sm:$0xff] }
 0x27f   : > { %v806_v15 = vadd.f32 %v805_v11, %v737_v0  ;;  %v1840_v16 = vpop.f32.mrb[2].mxu1  ;;  %v1749_v0 = vld [vmem:[%s2479_s4 + $0x38] sm:$0xff]  ;;  %v1768_v11 = vld [vmem:[%s2483_s8 + $0x10] sm:$0xff] }
 0x280   : > { %v826_v18 = vmul.f32 0.01, %v814_v8  ;;  %v817_v19 = vadd.f32 %v1840_v16, %v752_v12  ;;  %v808_v20 = vpop.f32.mrb[3].mxu1  ;;  %vm822_vm15 = vcmp.gt.f32.partialorder %v814_v8, 0.0  ;;  %1227 = vperm.xlu0 %1954, %v1749_v0   ;;  %v1769_v12 = vld [vmem:[%s2483_s8 + $0x18] sm:$0xff] }
 0x281   : > { %v824_v21 = vmul.f32 0.01, %v806_v15  ;;  %v809_v22 = vadd.f32 %v808_v20, %v742_v2  ;;  %vm820_vm1 = vcmp.gt.f32.partialorder %v806_v15, 0.0  ;;  %v1758_v2 = vld [vmem:[%s2481_s6 + $0x20] sm:$0xff]  ;;  %v1775_v16 = vld [vmem:[%s2485_s10 + $0x18] sm:$0xff] }
 0x282   : > { %vm823_vm2 = vcmp.gt.f32.partialorder %v817_v19, 0.0  ;;  %v827_v23 = vmul.f32 0.01, %v817_v19  ;;  %v830_v25 = vsel %vm822_vm15, %v814_v8, %v826_v18  ;;  %1321 = vperm.xlu1 %1955, %v1758_v2   ;;  %v1761_v8 = vld [vmem:[%s2481_s6 + $0x38] sm:$0xff]  ;;  %v1779_v18 = vld [vmem:[%s2487_s12 + $0x8] sm:$0x3f] }
 0x283   : > { %vm821_vm3 = vcmp.gt.f32.partialorder %v809_v22, 0.0  ;;  %v825_v24 = vmul.f32 0.01, %v809_v22  ;;  %v828_v27 = vsel %vm820_vm1, %v806_v15, %v824_v21  ;;  %v1774_v15 = vld [vmem:[%s2485_s10 + $0x10] sm:$0xff] }
 0x284   : > { %v831_v26 = vsel %vm823_vm2, %v817_v19, %v827_v23  ;;  %1326 = vperm.xlu0 %1954, %v1759_v4   ;;  %v1051_v19 = vpop.permute.xlu1 %1050  ;;  %v980_v23 = vpop.permute.xlu0 %979 }
 0x285   : > { %v835_v28 = vpack.c.bf16 %v831_v26, %v830_v25  ;;  %v829_v29 = vsel %vm821_vm3, %v809_v22, %v825_v24 }
 0x286   : > { %v834_v30 = vpack.c.bf16 %v829_v29, %v828_v27  ;;  %1331 = vperm.xlu1 %1955, %v1760_v7  }
 0x288   : > { %1842 = vmatpush3.bf16.msra.mxu1 %v834_v30  ;;  %1336 = vperm.xlu0 %1954, %v1761_v8   ;;  %v1111_v20 = vpop.permute.xlu1 %1110 }
 0x289   : > { %1843 = vmatprep.subr.bf16.mxu1 %v2037_v63 }
 0x28a   : > { %1426 = vperm.xlu1 %1955, %v1768_v11  }
 0x28c   : > { %1844 = vmatpush3.bf16.msra.mxu1 %v835_v28  ;;  %1431 = vperm.xlu0 %1954, %v1769_v12   ;;  %v1061_v21 = vpop.permute.xlu1 %1060  ;;  %v1056_v28 = vpop.permute.xlu0 %1055 }
 0x28d   : > { %1855 = vmatprep.subr.bf16.mxu1 %v2037_v63 }
 0x28e   : > { %1498 = vperm.xlu1 %1955, %v1774_v15  }
 0x28f   : > { %1846 = vmatmul.mubr.msk.bf16.vlgmr.msra.gmra.mrb[4].mxu1 %vm764_vm9, %v1960_v31 }
 0x290   : > { %1857 = vmatprep.mubr.msk.bf16.mxu1 %vm2038_vm14, %v2037_v63  ;;  %1503 = vperm.xlu0 %1954, %v1775_v16   ;;  %v1066_v22 = vpop.permute.xlu1 %1065 }
 0x292   : > { %1568 = vperm.xlu1 %1955, %v1779_v18  }
 0x294   : > { %v1126_v25 = vpop.permute.xlu1 %1125 }
 0x362   : > { %v890_v33 = vpop.f32.mrb[4].mxu1 }
 0x363   : > { %v891_v34 = vadd.f32 %v890_v33, %v841_v32  ;;  %v1847_v36 = vpop.f32.mrb[5].mxu1  ;;  %v1076_v33 = vpop.permute.xlu1 %1075 }
 0x364   : > { %v893_v38 = vpop.f32.mrb[6].mxu1  ;;  %v1071_v36 = vpop.permute.xlu0 %1070 }
 0x365   : > { %v899_v40 = vmul.f32 0.01, %v891_v34  ;;  %v894_v41 = vadd.f32 %v893_v38, %v846_v39  ;;  %v1848_v42 = vpop.f32.mrb[7].mxu1  ;;  %vm897_vm4 = vcmp.gt.f32.partialorder %v891_v34, 0.0 }
 0x367   : > { %vm898_vm5 = vcmp.gt.f32.partialorder %v894_v41, 0.0  ;;  %v900_v43 = vmul.f32 0.01, %v894_v41  ;;  %v901_v44 = vsel %vm897_vm4, %v891_v34, %v899_v40  ;;  %v1131_v38 = vpop.permute.xlu1 %1130 }
 0x368   : > { %v1116_v39 = vpop.permute.xlu0 %1115 }
 0x369   : > { %v902_v45 = vsel %vm898_vm5, %v894_v41, %v900_v43 }
 0x36a   : > { %v905_v46 = vpack.c.bf16 %v902_v45, %v901_v44  ;;  %v1090_v45 = vsub.s32 1, %v2270_v35 }
 0x36b   : > { %v1081_v43 = vpop.permute.xlu1 %1080 }
 0x36c   : > { %1850 = vmatpush3.bf16.msra.mxu0 %v905_v46  ;;  %v1121_v42 = vpop.permute.xlu0 %1120 }
 0x36f   : > { %1852 = vmatmul.mubr.msk.bf16.vlgmr.msra.gmra.mrb[4].mxu0 %vm923_vm6, %v1961_v47  ;;  %v1086_v50 = vpop.permute.xlu1 %1085 }
 0x370   : > { %1869 = vmatprep.mubr.msk.bf16.mxu0 %vm656_vm0, %v1962_v17  ;;  %v1136_v49 = vpop.permute.xlu0 %1135 }
 0x373   : > { %v1146_v17 = vpop.permute.xlu1 %1145 }
 0x442   : > { %v961_v13 = vpop.f32.mrb[4].mxu0 }
 0x443   : > { %v962_v10 = vadd.f32 %v961_v13, %v911_v9  ;;  %v1853_v14 = vpop.f32.mrb[5].mxu0 }
 0x444   : > { %v964_v52 = vpop.f32.mrb[6].mxu0 }
 0x445   : > { %v970_v53 = vmul.f32 0.01, %v962_v10  ;;  %v965_v54 = vadd.f32 %v964_v52, %v916_v51  ;;  %v1854_v55 = vpop.f32.mrb[7].mxu0  ;;  %vm968_vm7 = vcmp.gt.f32.partialorder %v962_v10, 0.0 }
 0x447   : > { %vm969_vm8 = vcmp.gt.f32.partialorder %v965_v54, 0.0  ;;  %v971_v56 = vmul.f32 0.01, %v965_v54  ;;  %v972_v57 = vsel %vm968_vm7, %v962_v10, %v970_v53 }
 0x449   : > { %v973_v58 = vsel %vm969_vm8, %v965_v54, %v971_v56 }
 0x44a   : > { %v975_v59 = vpack.c.bf16 %v973_v58, %v972_v57 }
 0x44c   : > { %1856 = vmatpush3.bf16.msra.mxu1 %v975_v59 }
 0x44f   : > { %1858 = vmatmul.mubr.msk.bf16.vlgmr.msra.gmra.mrb[8].mxu1 %vm923_vm6, %v974_v1  ;;  %v1141_v1 = vpop.permute.xlu0 %1140 }
 0x522   : > { %v1019_v24 = vpop.f32.mrb[8].mxu1 }
 0x523   : > { %v1020_v26 = vadd.f32 %v1019_v24, %v980_v23  ;;  %v1859_v27 = vpop.f32.mrb[9].mxu1 }
 0x524   : > { %v1022_v29 = vpop.f32.mrb[10].mxu1  ;;  %v1218_v27 = vpop.permute.xlu1 %1217 }
 0x525   : > { %v1733_v30 = vclamps-f32 %v1020_v26, 10.0  ;;  %v1860_v31 = vpop.f32.mrb[11].mxu1  ;;  %v1028_v40 = vrot.slane %v1020_v26, 3  ;;  %v1964_v26 = vld [vmem:[%s2480_s5 + $0x10] sm:$0xff]  }
 0x526   : > { %1877 = vmatprep.mubr.msk.bf16.mxu1 %vm764_vm9, %v1964_v26 }
 0x527   : > { %v1031_v32 = vsub.f32 0.0, %v1733_v30  ;;  %v1030_v41 = vsub.f32 %v2276_v37, %v1028_v40 }
 0x528   : > { %v1223_v29 = vpop.permute.xlu1 %1222 }
 0x529   : > { %v1032_v34 = vmul.f32 1.442695, %v1031_v32 }
 0x52b   : > { %1968 = vpow2.f32 %v1032_v34 }
 0x535   : > { %v1969_v44 = vpop.eup %1968 }
 0x536   : > { %v1034_v46 = vmul.f32 %v1969_v44, %v1030_v41 }
 0x538   : > { %v2388_v47 = vsel %vm1037_vm10, %v2276_v37, %v1034_v46 }
 0x539   : > { %v1091_v48 = vrot.slane %v2388_v47, %v1090_v45 }
 0x53b   : > { %v1095_v3 = vmul.f32 %v1091_v48, %v1066_v22  ;;  %v1093_v5 = vmul.f32 %v1091_v48, %v1056_v28  ;;  %v1096_v6 = vmul.f32 %v1091_v48, %v1071_v36  ;;  %v1097_v9 = vmul.f32 %v1091_v48, %v1076_v33  ;;  %v1213_v28 = vpop.permute.xlu0 %1212 }
 0x53c   : > { %v1094_v13 = vmul.f32 %v1091_v48, %v1061_v21  ;;  %v1092_v10 = vmul.f32 %v1091_v48, %v1051_v19  ;;  %v1098_v56 = vmul.f32 %v1091_v48, %v1081_v43  ;;  %v1099_v57 = vmul.f32 %v1091_v48, %v1086_v50 }
 0x53d   : > { %v1151_v14 = vadd.f32 %v1126_v25, %v1095_v3  ;;  %v1149_v51 = vadd.f32 %v1116_v39, %v1093_v5  ;;  %v1152_v55 = vadd.f32 %v1131_v38, %v1096_v6  ;;  %v1153_v59 = vadd.f32 %v1136_v49, %v1097_v9  ;;  %v1963_v25 = vld [vmem:[%s2478_s3 + $0x18] sm:$0xff]   ;;  %v1322_v6 = vpop.permute.xlu1 %1321 }
 0x53e   : > { %v1150_v52 = vadd.f32 %v1121_v42, %v1094_v13  ;;  %v1148_v53 = vadd.f32 %v1111_v20, %v1092_v10  ;;  %v1154_v62 = vadd.f32 %v1141_v1, %v1098_v56  ;;  %v1155_v0 = vadd.f32 %v1146_v17, %v1099_v57  ;;  %v1965_v5 = vld [vmem:[%s2480_s5 + $0x18] sm:$0xff]  }
 0x53f   : > { %v1181_v54 = vmul.f32 0.01, %v1149_v51  ;;  %v1183_v37 = vmul.f32 0.01, %v1151_v14  ;;  %vm1173_vm11 = vcmp.gt.f32.partialorder %v1149_v51, 0.0  ;;  %vm1175_vm12 = vcmp.gt.f32.partialorder %v1151_v14, 0.0  ;;  %v1228_v33 = vpop.permute.xlu0 %1227 }
 0x540   : > { %v1182_v58 = vmul.f32 0.01, %v1150_v52  ;;  %vm1174_vm13 = vcmp.gt.f32.partialorder %v1150_v52, 0.0  ;;  %vm1172_vm15 = vcmp.gt.f32.partialorder %v1148_v53, 0.0  ;;  %v1180_v60 = vmul.f32 0.01, %v1148_v53 }
 0x541   : > { %v1184_v61 = vmul.f32 0.01, %v1152_v55  ;;  %v1189_v2 = vsel %vm1173_vm11, %v1149_v51, %v1181_v54  ;;  %v1185_v4 = vmul.f32 0.01, %v1153_v59  ;;  %v1191_v11 = vsel %vm1175_vm12, %v1151_v14, %v1183_v37  ;;  %v1332_v13 = vpop.permute.xlu1 %1331 }
 0x542   : > { %v1188_v7 = vsel %vm1172_vm15, %v1148_v53, %v1180_v60  ;;  %v1190_v8 = vsel %vm1174_vm13, %v1150_v52, %v1182_v58  ;;  %vm1176_vm1 = vcmp.gt.f32.partialorder %v1152_v55, 0.0  ;;  %vm1177_vm2 = vcmp.gt.f32.partialorder %v1153_v59, 0.0 }
 0x543   : > { %v1201_v12 = vpack.c.bf16 %v1189_v2, %v1188_v7  ;;  %v1202_v15 = vpack.c.bf16 %v1191_v11, %v1190_v8  ;;  %v1186_v16 = vmul.f32 0.01, %v1154_v62  ;;  %v1187_v18 = vmul.f32 0.01, %v1155_v0  ;;  %v1327_v9 = vpop.permute.xlu0 %1326 }
 0x544   : > { %v1192_v19 = vsel %vm1176_vm1, %v1152_v55, %v1184_v61  ;;  %v1193_v20 = vsel %vm1177_vm2, %v1153_v59, %v1185_v4  ;;  %vm1178_vm3 = vcmp.gt.f32.partialorder %v1154_v62, 0.0  ;;  %vm1179_vm4 = vcmp.gt.f32.partialorder %v1155_v0, 0.0  ;;  %v1966_v4 = vld [vmem:[%s2482_s7 + $0x8] sm:$0xff]  }
 0x545   : > { %1861 = vmatprep.subr.bf16.mxu0 %v1201_v12  ;;  %v1203_v21 = vpack.c.bf16 %v1193_v20, %v1192_v19  ;;  %v1194_v22 = vsel %vm1178_vm3, %v1154_v62, %v1186_v16  ;;  %v1195_v23 = vsel %vm1179_vm4, %v1155_v0, %v1187_v18  ;;  %v1427_v7 = vpop.permute.xlu1 %1426 }
 0x546   : > { %1862 = vmatpush3.bf16.msra.mxu0 %v1201_v12  ;;  %v1204_v24 = vpack.c.bf16 %v1195_v23, %v1194_v22 }
 0x547   : > { %1863 = vmatprep.subr.bf16.mxu0 %v1202_v15  ;;  %v1337_v52 = vpop.permute.xlu0 %1336 }
 0x54a   : > { %1864 = vmatpush3.bf16.msra.mxu0 %v1202_v15 }
 0x54b   : > { %1865 = vmatprep.subr.bf16.mxu0 %v1203_v21  ;;  %v1432_v15 = vpop.permute.xlu0 %1431 }
 0x54e   : > { %1866 = vmatpush3.bf16.msra.mxu0 %v1203_v21 }
 0x54f   : > { %1867 = vmatprep.subr.bf16.mxu0 %v1204_v24 }
 0x552   : > { %1868 = vmatpush3.bf16.msra.mxu0 %v1204_v24 }
 0x553   : > { %1889 = vmatprep.subr.bf16.mxu0 %v2037_v63 }
 0x555   : > { %1870 = vmatmul.mubr.msk.bf16.vlgmr.msra.gmra.mrb[8].mxu0 %vm656_vm0, %v1963_v25  ;;  %v1967_v25 = vld [vmem:[%s2484_s9 + $0x8] sm:$0xff]  }
 0x556   : > { %1891 = vmatprep.mubr.msk.bf16.mxu0 %vm2038_vm14, %v2037_v63 }
 0x628   : > { %v1871_v30 = vpop.f32.mrb[8].mxu0 }
 0x629   : > { %v1289_v31 = vadd.f32 %v1871_v30, %v1223_v29  ;;  %v1280_v32 = vpop.f32.mrb[9].mxu0  ;;  %v1504_v29 = vpop.permute.xlu0 %1503 }
 0x62a   : > { %v1281_v34 = vadd.f32 %v1280_v32, %v1213_v28  ;;  %v1872_v36 = vpop.f32.mrb[10].mxu0 }
 0x62b   : > { %v1301_v39 = vmul.f32 0.01, %v1289_v31  ;;  %v1292_v38 = vadd.f32 %v1872_v36, %v1228_v33  ;;  %v1283_v40 = vpop.f32.mrb[11].mxu0  ;;  %vm1297_vm0 = vcmp.gt.f32.partialorder %v1289_v31, 0.0 }
 0x62c   : > { %v1299_v41 = vmul.f32 0.01, %v1281_v34  ;;  %v1284_v42 = vadd.f32 %v1283_v40, %v1218_v27  ;;  %vm1295_vm5 = vcmp.gt.f32.partialorder %v1281_v34, 0.0  ;;  %v1778_v40 = vld [vmem:[%s2486_s11 + $0x4] sm:$0x7] }
 0x62d   : > { %vm1298_vm7 = vcmp.gt.f32.partialorder %v1292_v38, 0.0  ;;  %v1302_v43 = vmul.f32 0.01, %v1292_v38  ;;  %v1305_v45 = vsel %vm1297_vm0, %v1289_v31, %v1301_v39 }
 0x62e   : > { %vm1296_vm8 = vcmp.gt.f32.partialorder %v1284_v42, 0.0  ;;  %v1300_v44 = vmul.f32 0.01, %v1284_v42  ;;  %v1303_v48 = vsel %vm1295_vm5, %v1281_v34, %v1299_v41 }
 0x62f   : > { %v1306_v46 = vsel %vm1298_vm7, %v1292_v38, %v1302_v43 }
 0x630   : > { %v1304_v49 = vsel %vm1296_vm8, %v1284_v42, %v1300_v44  ;;  %v1313_v50 = vpack.c.bf16 %v1306_v46, %v1305_v45 }
 0x631   : > { %v1312_v3 = vpack.c.bf16 %v1304_v49, %v1303_v48 }
 0x633   : > { %1873 = vmatprep.subr.bf16.mxu1 %v1312_v3 }
 0x634   : > { %1874 = vmatpush3.bf16.msra.mxu1 %v1312_v3 }
 0x635   : > { %1875 = vmatprep.subr.bf16.mxu1 %v1313_v50 }
 0x638   : > { %1876 = vmatpush3.bf16.msra.mxu1 %v1313_v50 }
 0x639   : > { %1881 = vmatprep.subr.bf16.mxu1 %v2037_v63 }
 0x63b   : > { %1878 = vmatmul.mubr.msk.bf16.vlgmr.msra.gmra.mrb[12].mxu1 %vm764_vm9, %v1965_v5 }
 0x63c   : > { %1885 = vmatprep.mubr.msk.bf16.mxu1 %vm2038_vm14, %v2037_v63 }
 0x70e   : > { %v1879_v10 = vpop.f32.mrb[12].mxu1 }
 0x70f   : > { %v1398_v14 = vadd.f32 %v1879_v10, %v1332_v13  ;;  %v1389_v51 = vpop.f32.mrb[13].mxu1 }
 0x710   : > { %v1390_v53 = vadd.f32 %v1389_v51, %v1322_v6  ;;  %v1880_v54 = vpop.f32.mrb[14].mxu1 }
 0x711   : > { %v1410_v55 = vmul.f32 0.01, %v1398_v14  ;;  %v1401_v56 = vadd.f32 %v1880_v54, %v1337_v52  ;;  %v1392_v57 = vpop.f32.mrb[15].mxu1  ;;  %vm1406_vm10 = vcmp.gt.f32.partialorder %v1398_v14, 0.0 }
 0x712   : > { %v1408_v37 = vmul.f32 0.01, %v1390_v53  ;;  %v1393_v58 = vadd.f32 %v1392_v57, %v1327_v9  ;;  %vm1404_vm11 = vcmp.gt.f32.partialorder %v1390_v53, 0.0 }
 0x713   : > { %vm1407_vm12 = vcmp.gt.f32.partialorder %v1401_v56, 0.0  ;;  %v1411_v59 = vmul.f32 0.01, %v1401_v56  ;;  %v1414_v17 = vsel %vm1406_vm10, %v1398_v14, %v1410_v55 }
 0x714   : > { %vm1405_vm13 = vcmp.gt.f32.partialorder %v1393_v58, 0.0  ;;  %v1409_v1 = vmul.f32 0.01, %v1393_v58  ;;  %v1412_v61 = vsel %vm1404_vm11, %v1390_v53, %v1408_v37 }
 0x715   : > { %v1415_v60 = vsel %vm1407_vm12, %v1401_v56, %v1411_v59 }
 0x716   : > { %v1420_v62 = vpack.c.bf16 %v1415_v60, %v1414_v17  ;;  %v1413_v0 = vsel %vm1405_vm13, %v1393_v58, %v1409_v1 }
 0x717   : > { %v1419_v2 = vpack.c.bf16 %v1413_v0, %v1412_v61 }
 0x719   : > { %1882 = vmatpush3.bf16.msra.mxu1 %v1419_v2 }
 0x71a   : > { %1883 = vmatprep.subr.bf16.mxu1 %v2037_v63 }
 0x71d   : > { %1884 = vmatpush3.bf16.msra.mxu1 %v1420_v62 }
 0x71e   : > { %1895 = vmatprep.subr.bf16.mxu1 %v2037_v63 }
 0x720   : > { %1886 = vmatmul.mubr.msk.bf16.vlgmr.msra.gmra.mrb[16].mxu1 %vm764_vm9, %v1966_v4 }
 0x721   : > { %1897 = vmatprep.mubr.msk.bf16.mxu1 %vm2038_vm14, %v2037_v63  ;;  %v1499_v63 = vpop.permute.xlu1 %1498 }
 0x725   : > { %v1569_v41 = vpop.permute.xlu1 %1568 }
 0x7f3   : > { %v1476_v8 = vpop.f32.mrb[16].mxu1 }
 0x7f4   : > { %v1477_v11 = vadd.f32 %v1476_v8, %v1427_v7  ;;  %v1887_v12 = vpop.f32.mrb[17].mxu1 }
 0x7f5   : > { %v1479_v16 = vpop.f32.mrb[18].mxu1 }
 0x7f6   : > { %v1485_v18 = vmul.f32 0.01, %v1477_v11  ;;  %v1480_v19 = vadd.f32 %v1479_v16, %v1432_v15  ;;  %v1888_v20 = vpop.f32.mrb[19].mxu1  ;;  %vm1483_vm15 = vcmp.gt.f32.partialorder %v1477_v11, 0.0 }
 0x7f8   : > { %vm1484_vm1 = vcmp.gt.f32.partialorder %v1480_v19, 0.0  ;;  %v1486_v21 = vmul.f32 0.01, %v1480_v19  ;;  %v1487_v22 = vsel %vm1483_vm15, %v1477_v11, %v1485_v18 }
 0x7fa   : > { %v1488_v23 = vsel %vm1484_vm1, %v1480_v19, %v1486_v21 }
 0x7fb   : > { %v1492_v24 = vpack.c.bf16 %v1488_v23, %v1487_v22 }
 0x7fd   : > { %1890 = vmatpush3.bf16.msra.mxu0 %v1492_v24 }
 0x800   : > { %1892 = vmatmul.mubr.msk.bf16.vlgmr.msra.gmra.mrb[12].mxu0 %vm923_vm6, %v1967_v25 }
 0x8d3   : > { %v1548_v26 = vpop.f32.mrb[12].mxu0 }
 0x8d4   : > { %v1549_v27 = vadd.f32 %v1548_v26, %v1499_v63  ;;  %v1893_v28 = vpop.f32.mrb[13].mxu0 }
 0x8d5   : > { %v1551_v30 = vpop.f32.mrb[14].mxu0 }
 0x8d6   : > { %v1557_v31 = vmul.f32 0.01, %v1549_v27  ;;  %v1552_v32 = vadd.f32 %v1551_v30, %v1504_v29  ;;  %v1894_v33 = vpop.f32.mrb[15].mxu0  ;;  %vm1555_vm9 = vcmp.gt.f32.partialorder %v1549_v27, 0.0 }
 0x8d8   : > { %vm1556_vm14 = vcmp.gt.f32.partialorder %v1552_v32, 0.0  ;;  %v1558_v34 = vmul.f32 0.01, %v1552_v32  ;;  %v1559_v36 = vsel %vm1555_vm9, %v1549_v27, %v1557_v31 }
 0x8da   : > { %v1560_v39 = vsel %vm1556_vm14, %v1552_v32, %v1558_v34 }
 0x8db   : > { %v1563_v38 = vpack.c.bf16 %v1560_v39, %v1559_v36 }
 0x8dd   : > { %1896 = vmatpush3.bf16.msra.mxu1 %v1563_v38 }
 0x8e0   : > { %1898 = vmatmul.mubr.msk.bf16.vlgmr.msra.gmra.mrb[20].mxu1 %vm923_vm6, %v1778_v40  ;;  %vm1624_vm6 = vcmp.eq.s32.totalorder %v2270_v35, 1 }
 0x9b3   : > { %v1608_v42 = vpop.f32.mrb[20].mxu1 }
 0x9b4   : > { %v1609_v43 = vadd.f32 %v1608_v42, %v1569_v41  ;;  %v1899_v44 = vpop.f32.mrb[21].mxu1 }
 0x9b5   : > { %v1611_v45 = vpop.f32.mrb[22].mxu1 }
 0x9b6   : > { %v1781_v46 = vclamps-f32 %v1609_v43, 10.0  ;;  %v1900_v48 = vpop.f32.mrb[23].mxu1  ;;  %v1617_v3 = vrot.slane %v1609_v43, 3 }
 0x9b8   : > { %v1620_v49 = vsub.f32 0.0, %v1781_v46  ;;  %v1619_v5 = vsub.f32 %v2388_v47, %v1617_v3 }
 0x9ba   : > { %v1621_v50 = vmul.f32 1.442695, %v1620_v49 }
 0x9bc   : > { %1970 = vpow2.f32 %v1621_v50 }
 0x9c6   : > { %v1971_v6 = vpop.eup %1970 }
 0x9c7   : > { %v1623_v9 = vmul.f32 %v1971_v6, %v1619_v5 }
 0x9c9   : > { %v1625_v13 = vsel %vm1624_vm6, %v2388_v47, %v1623_v9 }
 0x9ca   : > { %1626 = vst [vmem:[%s446_s30] sm:$0x7] %v1625_v13 }
 0x9cb   : > { %1985 = shalt.err (!%p1982_p3)
}
 0x9cc   : > { %s1986_s0 = scalar_lea.hbm %s2432_s20, 64  ;;  %s1990_s15 = scalar_lea.hbm %s2488_s13, 128 }
 0x9cd   : > { %p1987_p4 = scmp.ne.s32.totalorder %s2432_s20, %s1986_s0  ;;  %p1991_p9 = scmp.lt.u32.totalorder %s2432_s20, %s2488_s13 }
 0x9ce   : > { %p1992_p10 = scmp.lt.u32.totalorder %s1990_s15, %s1986_s0  ;;  %p1994_p12 = scmp.lt.u32.totalorder %s1986_s0, %s2432_s20 }
 0x9cf   : > { %p1988_p7 = pnand %p1987_p4, %p2149_p5 }
 0x9d0   : > { %p1993_p11 = por %p1992_p10, %p1991_p9 }
 0x9d1   : > { %p1989_p8 = pneg %p1988_p7 }
 0x9d2   : > { %p1995_p13 = por %p1994_p12, %p1993_p11 }
 0x9d4   : > { %p1996_p0 = pnand %p1995_p13, %p1989_p8 }
 0x9d6   : > { %1999 = shalt.err (!%p1996_p0)
}
 0x9d7   : > { %1901 = dma.vmem_to_hbm [thread:$0]  (%p2149_p5), %s2434_s22, 64, %s2432_s20, %s1628_s29  }
 0x9d8 PF: > { %p1907_p1 = scmp.ge.s32.totalorder %s2034_s28, 2  ;;  %s1653_s17 = sand.u32 1, %s2022_s25  }
 0x9d9   : > { %s1654_s21 = scalar_lea.sflag [#allocation4], %s1653_s17 }
 0x9da   : > { %p1904_p2 = pnand %p1907_p1, %p2153_p6 }
 0x9dc   : > { %2017 = dma.done.wait (!%p1904_p2), %s1654_s21, 64  }
 0x9dd   : > { %2019 = vsyncadd (!%p1904_p2), %s1654_s21, 4294967232  ;;  %s2496_s23 = sld [smem:[#allocation6_spill]]  ;;  %s2497_s27 = sld [smem:[#allocation7_spill]] }
 0x9de   : > { %p23_p3 = scmp.ge.s32.totalorder %s2136_s14, 4   ;;  %s2498_s25 = smov %s2026_s26 }
 0x9df   : > { %s2500_s28 = smov %s2136_s14 }
 0x9e0   :  { %25 = sbr.rel (!%p23_p3) target bundleno = 5 (0x5), region = 121 }
 0x9e3   : > { %s2499_s26 = smov %s2496_s23 }
 0x9e7   :  { %1659 = vsyncpa [#allocation4], 1 }
 0x9e8   :  { %1661 = vsyncpa [#allocation4 + $0x1], 1 }

</bundles_post_ra>
